<compile_context>
chip_gen: v6e
topology: v6e:2x2x1
jax: 0.10.0
libtpu: 0.0.40
codegen_flags: <defaults>
</compile_context>

<pallas_src>
import functools

import jax
import jax.numpy as jnp
from jax import lax
from jax.experimental import pallas as pl
from jax.experimental.pallas import tpu as pltpu


def _resnet_block_kernel(x_ref, w1_ref, b1_ref, w2_ref, b2_ref, o_ref,
                         *, C, K1, K2, O2, stride):
    """Fused conv1 -> BatchNorm2d(1) -> conv2 -> ReLU.

    x_ref : (N, C, H, W)    f32, VMEM
    w1_ref: (C*K1*K1,)      f32, SMEM   taps in (c, kh, kw) order (single out-channel)
    b1_ref: (1,)            f32, SMEM
    w2_ref: (O2*K2*K2,)     f32, SMEM   taps in (o, kh, kw) order (single in-channel)
    b2_ref: (O2,)           f32, SMEM
    o_ref : (N, O2, H2, W2) f32, VMEM
    """
    N, _, H, W = x_ref.shape
    # Dense (stride-1) conv output sizes; strided sizes after one decimation/stage.
    H1d, W1d = H - K1 + 1, W - K1 + 1
    H1 = (H - K1) // stride + 1
    W1 = (W - K1) // stride + 1
    H2d, W2d = H1 - K2 + 1, W1 - K2 + 1

    x = x_ref[...]                                       # load full slab once

    # -------- conv1 (single output channel) -------------------------------------
    # One shifted view of the WHOLE (N, C, h, w) slab per (i, j) tap (K1*K1 views),
    # then per-channel scalar MACs on the already-shifted slab.
    acc = jnp.full((N, H1d, W1d), b1_ref[0], dtype=jnp.float32)
    for i in range(K1):
        for j in range(K1):
            shifted = x[:, :, i:i + H1d, j:j + W1d]      # (N, C, H1d, W1d)
            for c in range(C):
                w = w1_ref[c * K1 * K1 + i * K1 + j]     # SMEM scalar tap weight
                acc = acc + w * shifted[:, c]
    if stride > 1:
        acc = acc[:, ::stride, ::stride]                 # decimate once per stage

    # -------- BatchNorm2d(num_features=1), training-mode batch statistics --------
    # Two whole-array reduction trees (numerically-safe two-pass variance).
    inv_count = 1.0 / float(N * H1 * W1)
    mean = jnp.sum(acc) * inv_count
    ssq = jnp.sum(jnp.square(acc - mean))
    inv_std = lax.rsqrt(ssq * inv_count + 1e-5)          # biased variance + eps
    xn = (acc - mean) * inv_std                          # gamma=1, beta=0

    # -------- conv2 + ReLU --------------------------------------------------------
    # Hoist the K2*K2 shifted views of xn; reuse them for every output channel.
    taps = [xn[:, i:i + H2d, j:j + W2d]                  # each (N, H2d, W2d)
            for i in range(K2) for j in range(K2)]
    outs = []
    for o in range(O2):
        acc2 = jnp.full((N, H2d, W2d), b2_ref[o], dtype=jnp.float32)
        for t, tp in enumerate(taps):
            acc2 = acc2 + w2_ref[o * K2 * K2 + t] * tp
        if stride > 1:
            acc2 = acc2[:, ::stride, ::stride]
        outs.append(jnp.maximum(acc2, 0.0))
    o_ref[...] = jnp.stack(outs, axis=1)                 # single stacked store


def resnet_block_forward(x, conv1_w, conv1_b, conv2_w, conv2_b, *, stride=1):
    """x: (N, C, H, W) f32; conv weights in PyTorch OIHW layout."""
    N, C, H, W = x.shape
    O1, C1, K1, _ = conv1_w.shape
    O2, C2, K2, _ = conv2_w.shape
    assert O1 == 1 and C1 == C, "BatchNorm2d(num_features=1) requires conv1 out_channels == 1"
    assert C2 == 1, "conv2 in_channels must equal conv1 out_channels (1)"

    H1 = (H - K1) // stride + 1
    W1 = (W - K1) // stride + 1
    H2 = (H1 - K2) // stride + 1
    W2 = (W1 - K2) // stride + 1

    # Layout plumbing only: flatten the tiny conv weights (contiguous reshape) so
    # they live as 1-D SMEM arrays read as scalar taps inside the kernel.
    w1_flat = conv1_w.reshape(-1).astype(jnp.float32)
    w2_flat = conv2_w.reshape(-1).astype(jnp.float32)

    kernel = functools.partial(_resnet_block_kernel,
                               C=C, K1=K1, K2=K2, O2=O2, stride=stride)

    return pl.pallas_call(
        kernel,
        out_shape=jax.ShapeDtypeStruct((N, O2, H2, W2), jnp.float32),
        in_specs=[
            pl.BlockSpec(memory_space=pltpu.MemorySpace.VMEM),   # x (whole array)
            pl.BlockSpec(memory_space=pltpu.MemorySpace.SMEM),   # conv1 taps
            pl.BlockSpec(memory_space=pltpu.MemorySpace.SMEM),   # conv1 bias
            pl.BlockSpec(memory_space=pltpu.MemorySpace.SMEM),   # conv2 taps
            pl.BlockSpec(memory_space=pltpu.MemorySpace.SMEM),   # conv2 bias
        ],
        out_specs=pl.BlockSpec(memory_space=pltpu.MemorySpace.VMEM),
    )(x.astype(jnp.float32), w1_flat, conv1_b.astype(jnp.float32),
      w2_flat, conv2_b.astype(jnp.float32))


def _ref_forward(x, w1, b1, w2, b2, stride):
    # Pure-JAX reference with identical semantics (correctness check only).
    dn = ("NCHW", "OIHW", "NCHW")
    y = lax.conv_general_dilated(x, w1, (stride, stride), "VALID",
                                 dimension_numbers=dn) + b1.reshape(1, -1, 1, 1)
    mean = jnp.mean(y)
    var = jnp.mean(jnp.square(y - mean))
    y = (y - mean) * lax.rsqrt(var + 1e-5)
    y = lax.conv_general_dilated(y, w2, (stride, stride), "VALID",
                                 dimension_numbers=dn) + b2.reshape(1, -1, 1, 1)
    return jnp.maximum(y, 0.0)


if __name__ == "__main__":
    key = jax.random.PRNGKey(0)
    k_x, k_w1, k_b1, k_w2, k_b2 = jax.random.split(key, 5)

    # ResNetBlock(input_channels=4, input_channels1=1, output_channels=1,
    #             output_channels1=4, kernel_size=3, kernel_size1=3, stride=1)
    N, C, H, W = 2, 4, 16, 16
    O1, K1 = 1, 3            # conv1 out-channels forced to 1 by BatchNorm2d(num_features=1)
    O2, K2 = 4, 3
    stride = 1

    def torch_conv_default_init(kw, kb, out_c, in_c, k):
        # PyTorch Conv2d default init: U(+-1/sqrt(fan_in)) for weight and bias.
        fan_in = in_c * k * k
        bound = 1.0 / (fan_in ** 0.5)
        w = jax.random.uniform(kw, (out_c, in_c, k, k), jnp.float32, -bound, bound)
        b = jax.random.uniform(kb, (out_c,), jnp.float32, -bound, bound)
        return w, b

    w1, b1 = torch_conv_default_init(k_w1, k_b1, O1, C, K1)
    w2, b2 = torch_conv_default_init(k_w2, k_b2, O2, 1, K2)
    x = jax.random.normal(k_x, (N, C, H, W), jnp.float32)

    fwd = jax.jit(functools.partial(resnet_block_forward, stride=stride))
    out = jax.block_until_ready(fwd(x, w1, b1, w2, b2))

    assert out.shape == (2, 4, 12, 12) and out.dtype == jnp.float32

    ref = jax.block_until_ready(_ref_forward(x, w1, b1, w2, b2, stride))
    max_err = float(jnp.max(jnp.abs(out - ref)))
    assert max_err < 1e-4, f"max abs error {max_err}"

    print("KERNEL_OK")
</pallas_src>

<mosaic_0001>
module attributes {stable_mosaic.version = 11 : i64} {
  func.func @_resnet_block_kernel(%arg0: memref<2x4x16x16xf32, #tpu.memory_space<vmem>>, %arg1: memref<36xf32, #tpu.memory_space<smem>>, %arg2: memref<1xf32, #tpu.memory_space<smem>>, %arg3: memref<36xf32, #tpu.memory_space<smem>>, %arg4: memref<4xf32, #tpu.memory_space<smem>>, %arg5: memref<2x4x12x12xf32, #tpu.memory_space<vmem>>) attributes {dimension_semantics = [], scalar_prefetch = 0 : i64, scratch_operands = 0 : i64, tpu.core_type = #tpu.core_type<tc>} {
    %c0 = arith.constant 0 : index
    %c0_0 = arith.constant 0 : index
    %c0_1 = arith.constant 0 : index
    %c0_2 = arith.constant 0 : index
    %0 = vector.load %arg0[%c0, %c0_0, %c0_1, %c0_2] : memref<2x4x16x16xf32, #tpu.memory_space<vmem>>, vector<2x4x16x16xf32>
    %c0_3 = arith.constant 0 : index
    %1 = memref.load %arg2[%c0_3] : memref<1xf32, #tpu.memory_space<smem>>
    %2 = vector.broadcast %1 : f32 to vector<2x14x14xf32>
    %3 = vector.extract_strided_slice %0 {offsets = [0, 0, 0, 0], sizes = [2, 4, 14, 14], strides = [1, 1, 1, 1]} : vector<2x4x16x16xf32> to vector<2x4x14x14xf32>
    %c0_4 = arith.constant 0 : index
    %4 = memref.load %arg1[%c0_4] : memref<36xf32, #tpu.memory_space<smem>>
    %5 = vector.extract_strided_slice %3 {offsets = [0, 0, 0, 0], sizes = [2, 1, 14, 14], strides = [1, 1, 1, 1]} : vector<2x4x14x14xf32> to vector<2x1x14x14xf32>
    %6 = vector.shape_cast %5 : vector<2x1x14x14xf32> to vector<2x14x14xf32>
    %7 = vector.broadcast %4 : f32 to vector<2x14x14xf32>
    %8 = arith.mulf %7, %6 : vector<2x14x14xf32>
    %9 = arith.addf %2, %8 : vector<2x14x14xf32>
    %c9 = arith.constant 9 : index
    %10 = memref.load %arg1[%c9] : memref<36xf32, #tpu.memory_space<smem>>
    %11 = vector.extract_strided_slice %3 {offsets = [0, 1, 0, 0], sizes = [2, 1, 14, 14], strides = [1, 1, 1, 1]} : vector<2x4x14x14xf32> to vector<2x1x14x14xf32>
    %12 = vector.shape_cast %11 : vector<2x1x14x14xf32> to vector<2x14x14xf32>
    %13 = vector.broadcast %10 : f32 to vector<2x14x14xf32>
    %14 = arith.mulf %13, %12 : vector<2x14x14xf32>
    %15 = arith.addf %9, %14 : vector<2x14x14xf32>
    %c18 = arith.constant 18 : index
    %16 = memref.load %arg1[%c18] : memref<36xf32, #tpu.memory_space<smem>>
    %17 = vector.extract_strided_slice %3 {offsets = [0, 2, 0, 0], sizes = [2, 1, 14, 14], strides = [1, 1, 1, 1]} : vector<2x4x14x14xf32> to vector<2x1x14x14xf32>
    %18 = vector.shape_cast %17 : vector<2x1x14x14xf32> to vector<2x14x14xf32>
    %19 = vector.broadcast %16 : f32 to vector<2x14x14xf32>
    %20 = arith.mulf %19, %18 : vector<2x14x14xf32>
    %21 = arith.addf %15, %20 : vector<2x14x14xf32>
    %c27 = arith.constant 27 : index
    %22 = memref.load %arg1[%c27] : memref<36xf32, #tpu.memory_space<smem>>
    %23 = vector.extract_strided_slice %3 {offsets = [0, 3, 0, 0], sizes = [2, 1, 14, 14], strides = [1, 1, 1, 1]} : vector<2x4x14x14xf32> to vector<2x1x14x14xf32>
    %24 = vector.shape_cast %23 : vector<2x1x14x14xf32> to vector<2x14x14xf32>
    %25 = vector.broadcast %22 : f32 to vector<2x14x14xf32>
    %26 = arith.mulf %25, %24 : vector<2x14x14xf32>
    %27 = arith.addf %21, %26 : vector<2x14x14xf32>
    %28 = vector.extract_strided_slice %0 {offsets = [0, 0, 0, 1], sizes = [2, 4, 14, 14], strides = [1, 1, 1, 1]} : vector<2x4x16x16xf32> to vector<2x4x14x14xf32>
    %c1 = arith.constant 1 : index
    %29 = memref.load %arg1[%c1] : memref<36xf32, #tpu.memory_space<smem>>
    %30 = vector.extract_strided_slice %28 {offsets = [0, 0, 0, 0], sizes = [2, 1, 14, 14], strides = [1, 1, 1, 1]} : vector<2x4x14x14xf32> to vector<2x1x14x14xf32>
    %31 = vector.shape_cast %30 : vector<2x1x14x14xf32> to vector<2x14x14xf32>
    %32 = vector.broadcast %29 : f32 to vector<2x14x14xf32>
    %33 = arith.mulf %32, %31 : vector<2x14x14xf32>
    %34 = arith.addf %27, %33 : vector<2x14x14xf32>
    %c10 = arith.constant 10 : index
    %35 = memref.load %arg1[%c10] : memref<36xf32, #tpu.memory_space<smem>>
    %36 = vector.extract_strided_slice %28 {offsets = [0, 1, 0, 0], sizes = [2, 1, 14, 14], strides = [1, 1, 1, 1]} : vector<2x4x14x14xf32> to vector<2x1x14x14xf32>
    %37 = vector.shape_cast %36 : vector<2x1x14x14xf32> to vector<2x14x14xf32>
    %38 = vector.broadcast %35 : f32 to vector<2x14x14xf32>
    %39 = arith.mulf %38, %37 : vector<2x14x14xf32>
    %40 = arith.addf %34, %39 : vector<2x14x14xf32>
    %c19 = arith.constant 19 : index
    %41 = memref.load %arg1[%c19] : memref<36xf32, #tpu.memory_space<smem>>
    %42 = vector.extract_strided_slice %28 {offsets = [0, 2, 0, 0], sizes = [2, 1, 14, 14], strides = [1, 1, 1, 1]} : vector<2x4x14x14xf32> to vector<2x1x14x14xf32>
    %43 = vector.shape_cast %42 : vector<2x1x14x14xf32> to vector<2x14x14xf32>
    %44 = vector.broadcast %41 : f32 to vector<2x14x14xf32>
    %45 = arith.mulf %44, %43 : vector<2x14x14xf32>
    %46 = arith.addf %40, %45 : vector<2x14x14xf32>
    %c28 = arith.constant 28 : index
    %47 = memref.load %arg1[%c28] : memref<36xf32, #tpu.memory_space<smem>>
    %48 = vector.extract_strided_slice %28 {offsets = [0, 3, 0, 0], sizes = [2, 1, 14, 14], strides = [1, 1, 1, 1]} : vector<2x4x14x14xf32> to vector<2x1x14x14xf32>
    %49 = vector.shape_cast %48 : vector<2x1x14x14xf32> to vector<2x14x14xf32>
    %50 = vector.broadcast %47 : f32 to vector<2x14x14xf32>
    %51 = arith.mulf %50, %49 : vector<2x14x14xf32>
    %52 = arith.addf %46, %51 : vector<2x14x14xf32>
    %53 = vector.extract_strided_slice %0 {offsets = [0, 0, 0, 2], sizes = [2, 4, 14, 14], strides = [1, 1, 1, 1]} : vector<2x4x16x16xf32> to vector<2x4x14x14xf32>
    %c2 = arith.constant 2 : index
    %54 = memref.load %arg1[%c2] : memref<36xf32, #tpu.memory_space<smem>>
    %55 = vector.extract_strided_slice %53 {offsets = [0, 0, 0, 0], sizes = [2, 1, 14, 14], strides = [1, 1, 1, 1]} : vector<2x4x14x14xf32> to vector<2x1x14x14xf32>
    %56 = vector.shape_cast %55 : vector<2x1x14x14xf32> to vector<2x14x14xf32>
    %57 = vector.broadcast %54 : f32 to vector<2x14x14xf32>
    %58 = arith.mulf %57, %56 : vector<2x14x14xf32>
    %59 = arith.addf %52, %58 : vector<2x14x14xf32>
    %c11 = arith.constant 11 : index
    %60 = memref.load %arg1[%c11] : memref<36xf32, #tpu.memory_space<smem>>
    %61 = vector.extract_strided_slice %53 {offsets = [0, 1, 0, 0], sizes = [2, 1, 14, 14], strides = [1, 1, 1, 1]} : vector<2x4x14x14xf32> to vector<2x1x14x14xf32>
    %62 = vector.shape_cast %61 : vector<2x1x14x14xf32> to vector<2x14x14xf32>
    %63 = vector.broadcast %60 : f32 to vector<2x14x14xf32>
    %64 = arith.mulf %63, %62 : vector<2x14x14xf32>
    %65 = arith.addf %59, %64 : vector<2x14x14xf32>
    %c20 = arith.constant 20 : index
    %66 = memref.load %arg1[%c20] : memref<36xf32, #tpu.memory_space<smem>>
    %67 = vector.extract_strided_slice %53 {offsets = [0, 2, 0, 0], sizes = [2, 1, 14, 14], strides = [1, 1, 1, 1]} : vector<2x4x14x14xf32> to vector<2x1x14x14xf32>
    %68 = vector.shape_cast %67 : vector<2x1x14x14xf32> to vector<2x14x14xf32>
    %69 = vector.broadcast %66 : f32 to vector<2x14x14xf32>
    %70 = arith.mulf %69, %68 : vector<2x14x14xf32>
    %71 = arith.addf %65, %70 : vector<2x14x14xf32>
    %c29 = arith.constant 29 : index
    %72 = memref.load %arg1[%c29] : memref<36xf32, #tpu.memory_space<smem>>
    %73 = vector.extract_strided_slice %53 {offsets = [0, 3, 0, 0], sizes = [2, 1, 14, 14], strides = [1, 1, 1, 1]} : vector<2x4x14x14xf32> to vector<2x1x14x14xf32>
    %74 = vector.shape_cast %73 : vector<2x1x14x14xf32> to vector<2x14x14xf32>
    %75 = vector.broadcast %72 : f32 to vector<2x14x14xf32>
    %76 = arith.mulf %75, %74 : vector<2x14x14xf32>
    %77 = arith.addf %71, %76 : vector<2x14x14xf32>
    %78 = vector.extract_strided_slice %0 {offsets = [0, 0, 1, 0], sizes = [2, 4, 14, 14], strides = [1, 1, 1, 1]} : vector<2x4x16x16xf32> to vector<2x4x14x14xf32>
    %c3 = arith.constant 3 : index
    %79 = memref.load %arg1[%c3] : memref<36xf32, #tpu.memory_space<smem>>
    %80 = vector.extract_strided_slice %78 {offsets = [0, 0, 0, 0], sizes = [2, 1, 14, 14], strides = [1, 1, 1, 1]} : vector<2x4x14x14xf32> to vector<2x1x14x14xf32>
    %81 = vector.shape_cast %80 : vector<2x1x14x14xf32> to vector<2x14x14xf32>
    %82 = vector.broadcast %79 : f32 to vector<2x14x14xf32>
    %83 = arith.mulf %82, %81 : vector<2x14x14xf32>
    %84 = arith.addf %77, %83 : vector<2x14x14xf32>
    %c12 = arith.constant 12 : index
    %85 = memref.load %arg1[%c12] : memref<36xf32, #tpu.memory_space<smem>>
    %86 = vector.extract_strided_slice %78 {offsets = [0, 1, 0, 0], sizes = [2, 1, 14, 14], strides = [1, 1, 1, 1]} : vector<2x4x14x14xf32> to vector<2x1x14x14xf32>
    %87 = vector.shape_cast %86 : vector<2x1x14x14xf32> to vector<2x14x14xf32>
    %88 = vector.broadcast %85 : f32 to vector<2x14x14xf32>
    %89 = arith.mulf %88, %87 : vector<2x14x14xf32>
    %90 = arith.addf %84, %89 : vector<2x14x14xf32>
    %c21 = arith.constant 21 : index
    %91 = memref.load %arg1[%c21] : memref<36xf32, #tpu.memory_space<smem>>
    %92 = vector.extract_strided_slice %78 {offsets = [0, 2, 0, 0], sizes = [2, 1, 14, 14], strides = [1, 1, 1, 1]} : vector<2x4x14x14xf32> to vector<2x1x14x14xf32>
    %93 = vector.shape_cast %92 : vector<2x1x14x14xf32> to vector<2x14x14xf32>
    %94 = vector.broadcast %91 : f32 to vector<2x14x14xf32>
    %95 = arith.mulf %94, %93 : vector<2x14x14xf32>
    %96 = arith.addf %90, %95 : vector<2x14x14xf32>
    %c30 = arith.constant 30 : index
    %97 = memref.load %arg1[%c30] : memref<36xf32, #tpu.memory_space<smem>>
    %98 = vector.extract_strided_slice %78 {offsets = [0, 3, 0, 0], sizes = [2, 1, 14, 14], strides = [1, 1, 1, 1]} : vector<2x4x14x14xf32> to vector<2x1x14x14xf32>
    %99 = vector.shape_cast %98 : vector<2x1x14x14xf32> to vector<2x14x14xf32>
    %100 = vector.broadcast %97 : f32 to vector<2x14x14xf32>
    %101 = arith.mulf %100, %99 : vector<2x14x14xf32>
    %102 = arith.addf %96, %101 : vector<2x14x14xf32>
    %103 = vector.extract_strided_slice %0 {offsets = [0, 0, 1, 1], sizes = [2, 4, 14, 14], strides = [1, 1, 1, 1]} : vector<2x4x16x16xf32> to vector<2x4x14x14xf32>
    %c4 = arith.constant 4 : index
    %104 = memref.load %arg1[%c4] : memref<36xf32, #tpu.memory_space<smem>>
    %105 = vector.extract_strided_slice %103 {offsets = [0, 0, 0, 0], sizes = [2, 1, 14, 14], strides = [1, 1, 1, 1]} : vector<2x4x14x14xf32> to vector<2x1x14x14xf32>
    %106 = vector.shape_cast %105 : vector<2x1x14x14xf32> to vector<2x14x14xf32>
    %107 = vector.broadcast %104 : f32 to vector<2x14x14xf32>
    %108 = arith.mulf %107, %106 : vector<2x14x14xf32>
    %109 = arith.addf %102, %108 : vector<2x14x14xf32>
    %c13 = arith.constant 13 : index
    %110 = memref.load %arg1[%c13] : memref<36xf32, #tpu.memory_space<smem>>
    %111 = vector.extract_strided_slice %103 {offsets = [0, 1, 0, 0], sizes = [2, 1, 14, 14], strides = [1, 1, 1, 1]} : vector<2x4x14x14xf32> to vector<2x1x14x14xf32>
    %112 = vector.shape_cast %111 : vector<2x1x14x14xf32> to vector<2x14x14xf32>
    %113 = vector.broadcast %110 : f32 to vector<2x14x14xf32>
    %114 = arith.mulf %113, %112 : vector<2x14x14xf32>
    %115 = arith.addf %109, %114 : vector<2x14x14xf32>
    %c22 = arith.constant 22 : index
    %116 = memref.load %arg1[%c22] : memref<36xf32, #tpu.memory_space<smem>>
    %117 = vector.extract_strided_slice %103 {offsets = [0, 2, 0, 0], sizes = [2, 1, 14, 14], strides = [1, 1, 1, 1]} : vector<2x4x14x14xf32> to vector<2x1x14x14xf32>
    %118 = vector.shape_cast %117 : vector<2x1x14x14xf32> to vector<2x14x14xf32>
    %119 = vector.broadcast %116 : f32 to vector<2x14x14xf32>
    %120 = arith.mulf %119, %118 : vector<2x14x14xf32>
    %121 = arith.addf %115, %120 : vector<2x14x14xf32>
    %c31 = arith.constant 31 : index
    %122 = memref.load %arg1[%c31] : memref<36xf32, #tpu.memory_space<smem>>
    %123 = vector.extract_strided_slice %103 {offsets = [0, 3, 0, 0], sizes = [2, 1, 14, 14], strides = [1, 1, 1, 1]} : vector<2x4x14x14xf32> to vector<2x1x14x14xf32>
    %124 = vector.shape_cast %123 : vector<2x1x14x14xf32> to vector<2x14x14xf32>
    %125 = vector.broadcast %122 : f32 to vector<2x14x14xf32>
    %126 = arith.mulf %125, %124 : vector<2x14x14xf32>
    %127 = arith.addf %121, %126 : vector<2x14x14xf32>
    %128 = vector.extract_strided_slice %0 {offsets = [0, 0, 1, 2], sizes = [2, 4, 14, 14], strides = [1, 1, 1, 1]} : vector<2x4x16x16xf32> to vector<2x4x14x14xf32>
    %c5 = arith.constant 5 : index
    %129 = memref.load %arg1[%c5] : memref<36xf32, #tpu.memory_space<smem>>
    %130 = vector.extract_strided_slice %128 {offsets = [0, 0, 0, 0], sizes = [2, 1, 14, 14], strides = [1, 1, 1, 1]} : vector<2x4x14x14xf32> to vector<2x1x14x14xf32>
    %131 = vector.shape_cast %130 : vector<2x1x14x14xf32> to vector<2x14x14xf32>
    %132 = vector.broadcast %129 : f32 to vector<2x14x14xf32>
    %133 = arith.mulf %132, %131 : vector<2x14x14xf32>
    %134 = arith.addf %127, %133 : vector<2x14x14xf32>
    %c14 = arith.constant 14 : index
    %135 = memref.load %arg1[%c14] : memref<36xf32, #tpu.memory_space<smem>>
    %136 = vector.extract_strided_slice %128 {offsets = [0, 1, 0, 0], sizes = [2, 1, 14, 14], strides = [1, 1, 1, 1]} : vector<2x4x14x14xf32> to vector<2x1x14x14xf32>
    %137 = vector.shape_cast %136 : vector<2x1x14x14xf32> to vector<2x14x14xf32>
    %138 = vector.broadcast %135 : f32 to vector<2x14x14xf32>
    %139 = arith.mulf %138, %137 : vector<2x14x14xf32>
    %140 = arith.addf %134, %139 : vector<2x14x14xf32>
    %c23 = arith.constant 23 : index
    %141 = memref.load %arg1[%c23] : memref<36xf32, #tpu.memory_space<smem>>
    %142 = vector.extract_strided_slice %128 {offsets = [0, 2, 0, 0], sizes = [2, 1, 14, 14], strides = [1, 1, 1, 1]} : vector<2x4x14x14xf32> to vector<2x1x14x14xf32>
    %143 = vector.shape_cast %142 : vector<2x1x14x14xf32> to vector<2x14x14xf32>
    %144 = vector.broadcast %141 : f32 to vector<2x14x14xf32>
    %145 = arith.mulf %144, %143 : vector<2x14x14xf32>
    %146 = arith.addf %140, %145 : vector<2x14x14xf32>
    %c32 = arith.constant 32 : index
    %147 = memref.load %arg1[%c32] : memref<36xf32, #tpu.memory_space<smem>>
    %148 = vector.extract_strided_slice %128 {offsets = [0, 3, 0, 0], sizes = [2, 1, 14, 14], strides = [1, 1, 1, 1]} : vector<2x4x14x14xf32> to vector<2x1x14x14xf32>
    %149 = vector.shape_cast %148 : vector<2x1x14x14xf32> to vector<2x14x14xf32>
    %150 = vector.broadcast %147 : f32 to vector<2x14x14xf32>
    %151 = arith.mulf %150, %149 : vector<2x14x14xf32>
    %152 = arith.addf %146, %151 : vector<2x14x14xf32>
    %153 = vector.extract_strided_slice %0 {offsets = [0, 0, 2, 0], sizes = [2, 4, 14, 14], strides = [1, 1, 1, 1]} : vector<2x4x16x16xf32> to vector<2x4x14x14xf32>
    %c6 = arith.constant 6 : index
    %154 = memref.load %arg1[%c6] : memref<36xf32, #tpu.memory_space<smem>>
    %155 = vector.extract_strided_slice %153 {offsets = [0, 0, 0, 0], sizes = [2, 1, 14, 14], strides = [1, 1, 1, 1]} : vector<2x4x14x14xf32> to vector<2x1x14x14xf32>
    %156 = vector.shape_cast %155 : vector<2x1x14x14xf32> to vector<2x14x14xf32>
    %157 = vector.broadcast %154 : f32 to vector<2x14x14xf32>
    %158 = arith.mulf %157, %156 : vector<2x14x14xf32>
    %159 = arith.addf %152, %158 : vector<2x14x14xf32>
    %c15 = arith.constant 15 : index
    %160 = memref.load %arg1[%c15] : memref<36xf32, #tpu.memory_space<smem>>
    %161 = vector.extract_strided_slice %153 {offsets = [0, 1, 0, 0], sizes = [2, 1, 14, 14], strides = [1, 1, 1, 1]} : vector<2x4x14x14xf32> to vector<2x1x14x14xf32>
    %162 = vector.shape_cast %161 : vector<2x1x14x14xf32> to vector<2x14x14xf32>
    %163 = vector.broadcast %160 : f32 to vector<2x14x14xf32>
    %164 = arith.mulf %163, %162 : vector<2x14x14xf32>
    %165 = arith.addf %159, %164 : vector<2x14x14xf32>
    %c24 = arith.constant 24 : index
    %166 = memref.load %arg1[%c24] : memref<36xf32, #tpu.memory_space<smem>>
    %167 = vector.extract_strided_slice %153 {offsets = [0, 2, 0, 0], sizes = [2, 1, 14, 14], strides = [1, 1, 1, 1]} : vector<2x4x14x14xf32> to vector<2x1x14x14xf32>
    %168 = vector.shape_cast %167 : vector<2x1x14x14xf32> to vector<2x14x14xf32>
    %169 = vector.broadcast %166 : f32 to vector<2x14x14xf32>
    %170 = arith.mulf %169, %168 : vector<2x14x14xf32>
    %171 = arith.addf %165, %170 : vector<2x14x14xf32>
    %c33 = arith.constant 33 : index
    %172 = memref.load %arg1[%c33] : memref<36xf32, #tpu.memory_space<smem>>
    %173 = vector.extract_strided_slice %153 {offsets = [0, 3, 0, 0], sizes = [2, 1, 14, 14], strides = [1, 1, 1, 1]} : vector<2x4x14x14xf32> to vector<2x1x14x14xf32>
    %174 = vector.shape_cast %173 : vector<2x1x14x14xf32> to vector<2x14x14xf32>
    %175 = vector.broadcast %172 : f32 to vector<2x14x14xf32>
    %176 = arith.mulf %175, %174 : vector<2x14x14xf32>
    %177 = arith.addf %171, %176 : vector<2x14x14xf32>
    %178 = vector.extract_strided_slice %0 {offsets = [0, 0, 2, 1], sizes = [2, 4, 14, 14], strides = [1, 1, 1, 1]} : vector<2x4x16x16xf32> to vector<2x4x14x14xf32>
    %c7 = arith.constant 7 : index
    %179 = memref.load %arg1[%c7] : memref<36xf32, #tpu.memory_space<smem>>
    %180 = vector.extract_strided_slice %178 {offsets = [0, 0, 0, 0], sizes = [2, 1, 14, 14], strides = [1, 1, 1, 1]} : vector<2x4x14x14xf32> to vector<2x1x14x14xf32>
    %181 = vector.shape_cast %180 : vector<2x1x14x14xf32> to vector<2x14x14xf32>
    %182 = vector.broadcast %179 : f32 to vector<2x14x14xf32>
    %183 = arith.mulf %182, %181 : vector<2x14x14xf32>
    %184 = arith.addf %177, %183 : vector<2x14x14xf32>
    %c16 = arith.constant 16 : index
    %185 = memref.load %arg1[%c16] : memref<36xf32, #tpu.memory_space<smem>>
    %186 = vector.extract_strided_slice %178 {offsets = [0, 1, 0, 0], sizes = [2, 1, 14, 14], strides = [1, 1, 1, 1]} : vector<2x4x14x14xf32> to vector<2x1x14x14xf32>
    %187 = vector.shape_cast %186 : vector<2x1x14x14xf32> to vector<2x14x14xf32>
    %188 = vector.broadcast %185 : f32 to vector<2x14x14xf32>
    %189 = arith.mulf %188, %187 : vector<2x14x14xf32>
    %190 = arith.addf %184, %189 : vector<2x14x14xf32>
    %c25 = arith.constant 25 : index
    %191 = memref.load %arg1[%c25] : memref<36xf32, #tpu.memory_space<smem>>
    %192 = vector.extract_strided_slice %178 {offsets = [0, 2, 0, 0], sizes = [2, 1, 14, 14], strides = [1, 1, 1, 1]} : vector<2x4x14x14xf32> to vector<2x1x14x14xf32>
    %193 = vector.shape_cast %192 : vector<2x1x14x14xf32> to vector<2x14x14xf32>
    %194 = vector.broadcast %191 : f32 to vector<2x14x14xf32>
    %195 = arith.mulf %194, %193 : vector<2x14x14xf32>
    %196 = arith.addf %190, %195 : vector<2x14x14xf32>
    %c34 = arith.constant 34 : index
    %197 = memref.load %arg1[%c34] : memref<36xf32, #tpu.memory_space<smem>>
    %198 = vector.extract_strided_slice %178 {offsets = [0, 3, 0, 0], sizes = [2, 1, 14, 14], strides = [1, 1, 1, 1]} : vector<2x4x14x14xf32> to vector<2x1x14x14xf32>
    %199 = vector.shape_cast %198 : vector<2x1x14x14xf32> to vector<2x14x14xf32>
    %200 = vector.broadcast %197 : f32 to vector<2x14x14xf32>
    %201 = arith.mulf %200, %199 : vector<2x14x14xf32>
    %202 = arith.addf %196, %201 : vector<2x14x14xf32>
    %203 = vector.extract_strided_slice %0 {offsets = [0, 0, 2, 2], sizes = [2, 4, 14, 14], strides = [1, 1, 1, 1]} : vector<2x4x16x16xf32> to vector<2x4x14x14xf32>
    %c8 = arith.constant 8 : index
    %204 = memref.load %arg1[%c8] : memref<36xf32, #tpu.memory_space<smem>>
    %205 = vector.extract_strided_slice %203 {offsets = [0, 0, 0, 0], sizes = [2, 1, 14, 14], strides = [1, 1, 1, 1]} : vector<2x4x14x14xf32> to vector<2x1x14x14xf32>
    %206 = vector.shape_cast %205 : vector<2x1x14x14xf32> to vector<2x14x14xf32>
    %207 = vector.broadcast %204 : f32 to vector<2x14x14xf32>
    %208 = arith.mulf %207, %206 : vector<2x14x14xf32>
    %209 = arith.addf %202, %208 : vector<2x14x14xf32>
    %c17 = arith.constant 17 : index
    %210 = memref.load %arg1[%c17] : memref<36xf32, #tpu.memory_space<smem>>
    %211 = vector.extract_strided_slice %203 {offsets = [0, 1, 0, 0], sizes = [2, 1, 14, 14], strides = [1, 1, 1, 1]} : vector<2x4x14x14xf32> to vector<2x1x14x14xf32>
    %212 = vector.shape_cast %211 : vector<2x1x14x14xf32> to vector<2x14x14xf32>
    %213 = vector.broadcast %210 : f32 to vector<2x14x14xf32>
    %214 = arith.mulf %213, %212 : vector<2x14x14xf32>
    %215 = arith.addf %209, %214 : vector<2x14x14xf32>
    %c26 = arith.constant 26 : index
    %216 = memref.load %arg1[%c26] : memref<36xf32, #tpu.memory_space<smem>>
    %217 = vector.extract_strided_slice %203 {offsets = [0, 2, 0, 0], sizes = [2, 1, 14, 14], strides = [1, 1, 1, 1]} : vector<2x4x14x14xf32> to vector<2x1x14x14xf32>
    %218 = vector.shape_cast %217 : vector<2x1x14x14xf32> to vector<2x14x14xf32>
    %219 = vector.broadcast %216 : f32 to vector<2x14x14xf32>
    %220 = arith.mulf %219, %218 : vector<2x14x14xf32>
    %221 = arith.addf %215, %220 : vector<2x14x14xf32>
    %c35 = arith.constant 35 : index
    %222 = memref.load %arg1[%c35] : memref<36xf32, #tpu.memory_space<smem>>
    %223 = vector.extract_strided_slice %203 {offsets = [0, 3, 0, 0], sizes = [2, 1, 14, 14], strides = [1, 1, 1, 1]} : vector<2x4x14x14xf32> to vector<2x1x14x14xf32>
    %224 = vector.shape_cast %223 : vector<2x1x14x14xf32> to vector<2x14x14xf32>
    %225 = vector.broadcast %222 : f32 to vector<2x14x14xf32>
    %226 = arith.mulf %225, %224 : vector<2x14x14xf32>
    %227 = arith.addf %221, %226 : vector<2x14x14xf32>
    %228 = vector.shape_cast %227 : vector<2x14x14xf32> to vector<1x2x14x14xf32>
    %cst = arith.constant dense<0.000000e+00> : vector<1xf32>
    %229 = vector.multi_reduction <add>, %228, %cst [1, 2, 3] : vector<1x2x14x14xf32> to vector<1xf32>
    %230 = vector.shape_cast %229 : vector<1xf32> to vector<1x1x1x1xf32>
    %231 = vector.extract %230[0, 0, 0, 0] : f32 from vector<1x1x1x1xf32>
    %cst_5 = arith.constant 0.00255102036 : f32
    %232 = arith.mulf %231, %cst_5 : f32
    %233 = vector.broadcast %232 : f32 to vector<2x14x14xf32>
    %234 = arith.subf %227, %233 : vector<2x14x14xf32>
    %235 = arith.mulf %234, %234 : vector<2x14x14xf32>
    %236 = vector.shape_cast %235 : vector<2x14x14xf32> to vector<1x2x14x14xf32>
    %cst_6 = arith.constant dense<0.000000e+00> : vector<1xf32>
    %237 = vector.multi_reduction <add>, %236, %cst_6 [1, 2, 3] : vector<1x2x14x14xf32> to vector<1xf32>
    %238 = vector.shape_cast %237 : vector<1xf32> to vector<1x1x1x1xf32>
    %239 = vector.extract %238[0, 0, 0, 0] : f32 from vector<1x1x1x1xf32>
    %cst_7 = arith.constant 0.00255102036 : f32
    %240 = arith.mulf %239, %cst_7 : f32
    %cst_8 = arith.constant 9.99999974E-6 : f32
    %241 = arith.addf %240, %cst_8 : f32
    %242 = math.rsqrt %241 : f32
    %243 = vector.broadcast %232 : f32 to vector<2x14x14xf32>
    %244 = arith.subf %227, %243 : vector<2x14x14xf32>
    %245 = vector.broadcast %242 : f32 to vector<2x14x14xf32>
    %246 = arith.mulf %244, %245 : vector<2x14x14xf32>
    %247 = vector.extract_strided_slice %246 {offsets = [0, 0, 0], sizes = [2, 12, 12], strides = [1, 1, 1]} : vector<2x14x14xf32> to vector<2x12x12xf32>
    %248 = vector.extract_strided_slice %246 {offsets = [0, 0, 1], sizes = [2, 12, 12], strides = [1, 1, 1]} : vector<2x14x14xf32> to vector<2x12x12xf32>
    %249 = vector.extract_strided_slice %246 {offsets = [0, 0, 2], sizes = [2, 12, 12], strides = [1, 1, 1]} : vector<2x14x14xf32> to vector<2x12x12xf32>
    %250 = vector.extract_strided_slice %246 {offsets = [0, 1, 0], sizes = [2, 12, 12], strides = [1, 1, 1]} : vector<2x14x14xf32> to vector<2x12x12xf32>
    %251 = vector.extract_strided_slice %246 {offsets = [0, 1, 1], sizes = [2, 12, 12], strides = [1, 1, 1]} : vector<2x14x14xf32> to vector<2x12x12xf32>
    %252 = vector.extract_strided_slice %246 {offsets = [0, 1, 2], sizes = [2, 12, 12], strides = [1, 1, 1]} : vector<2x14x14xf32> to vector<2x12x12xf32>
    %253 = vector.extract_strided_slice %246 {offsets = [0, 2, 0], sizes = [2, 12, 12], strides = [1, 1, 1]} : vector<2x14x14xf32> to vector<2x12x12xf32>
    %254 = vector.extract_strided_slice %246 {offsets = [0, 2, 1], sizes = [2, 12, 12], strides = [1, 1, 1]} : vector<2x14x14xf32> to vector<2x12x12xf32>
    %255 = vector.extract_strided_slice %246 {offsets = [0, 2, 2], sizes = [2, 12, 12], strides = [1, 1, 1]} : vector<2x14x14xf32> to vector<2x12x12xf32>
    %c0_9 = arith.constant 0 : index
    %256 = memref.load %arg4[%c0_9] : memref<4xf32, #tpu.memory_space<smem>>
    %257 = vector.broadcast %256 : f32 to vector<2x12x12xf32>
    %c0_10 = arith.constant 0 : index
    %258 = memref.load %arg3[%c0_10] : memref<36xf32, #tpu.memory_space<smem>>
    %259 = vector.broadcast %258 : f32 to vector<2x12x12xf32>
    %260 = arith.mulf %259, %247 : vector<2x12x12xf32>
    %261 = arith.addf %257, %260 : vector<2x12x12xf32>
    %c1_11 = arith.constant 1 : index
    %262 = memref.load %arg3[%c1_11] : memref<36xf32, #tpu.memory_space<smem>>
    %263 = vector.broadcast %262 : f32 to vector<2x12x12xf32>
    %264 = arith.mulf %263, %248 : vector<2x12x12xf32>
    %265 = arith.addf %261, %264 : vector<2x12x12xf32>
    %c2_12 = arith.constant 2 : index
    %266 = memref.load %arg3[%c2_12] : memref<36xf32, #tpu.memory_space<smem>>
    %267 = vector.broadcast %266 : f32 to vector<2x12x12xf32>
    %268 = arith.mulf %267, %249 : vector<2x12x12xf32>
    %269 = arith.addf %265, %268 : vector<2x12x12xf32>
    %c3_13 = arith.constant 3 : index
    %270 = memref.load %arg3[%c3_13] : memref<36xf32, #tpu.memory_space<smem>>
    %271 = vector.broadcast %270 : f32 to vector<2x12x12xf32>
    %272 = arith.mulf %271, %250 : vector<2x12x12xf32>
    %273 = arith.addf %269, %272 : vector<2x12x12xf32>
    %c4_14 = arith.constant 4 : index
    %274 = memref.load %arg3[%c4_14] : memref<36xf32, #tpu.memory_space<smem>>
    %275 = vector.broadcast %274 : f32 to vector<2x12x12xf32>
    %276 = arith.mulf %275, %251 : vector<2x12x12xf32>
    %277 = arith.addf %273, %276 : vector<2x12x12xf32>
    %c5_15 = arith.constant 5 : index
    %278 = memref.load %arg3[%c5_15] : memref<36xf32, #tpu.memory_space<smem>>
    %279 = vector.broadcast %278 : f32 to vector<2x12x12xf32>
    %280 = arith.mulf %279, %252 : vector<2x12x12xf32>
    %281 = arith.addf %277, %280 : vector<2x12x12xf32>
    %c6_16 = arith.constant 6 : index
    %282 = memref.load %arg3[%c6_16] : memref<36xf32, #tpu.memory_space<smem>>
    %283 = vector.broadcast %282 : f32 to vector<2x12x12xf32>
    %284 = arith.mulf %283, %253 : vector<2x12x12xf32>
    %285 = arith.addf %281, %284 : vector<2x12x12xf32>
    %c7_17 = arith.constant 7 : index
    %286 = memref.load %arg3[%c7_17] : memref<36xf32, #tpu.memory_space<smem>>
    %287 = vector.broadcast %286 : f32 to vector<2x12x12xf32>
    %288 = arith.mulf %287, %254 : vector<2x12x12xf32>
    %289 = arith.addf %285, %288 : vector<2x12x12xf32>
    %c8_18 = arith.constant 8 : index
    %290 = memref.load %arg3[%c8_18] : memref<36xf32, #tpu.memory_space<smem>>
    %291 = vector.broadcast %290 : f32 to vector<2x12x12xf32>
    %292 = arith.mulf %291, %255 : vector<2x12x12xf32>
    %293 = arith.addf %289, %292 : vector<2x12x12xf32>
    %cst_19 = arith.constant 0.000000e+00 : f32
    %294 = vector.broadcast %cst_19 : f32 to vector<2x12x12xf32>
    %295 = arith.maximumf %293, %294 : vector<2x12x12xf32>
    %c1_20 = arith.constant 1 : index
    %296 = memref.load %arg4[%c1_20] : memref<4xf32, #tpu.memory_space<smem>>
    %297 = vector.broadcast %296 : f32 to vector<2x12x12xf32>
    %c9_21 = arith.constant 9 : index
    %298 = memref.load %arg3[%c9_21] : memref<36xf32, #tpu.memory_space<smem>>
    %299 = vector.broadcast %298 : f32 to vector<2x12x12xf32>
    %300 = arith.mulf %299, %247 : vector<2x12x12xf32>
    %301 = arith.addf %297, %300 : vector<2x12x12xf32>
    %c10_22 = arith.constant 10 : index
    %302 = memref.load %arg3[%c10_22] : memref<36xf32, #tpu.memory_space<smem>>
    %303 = vector.broadcast %302 : f32 to vector<2x12x12xf32>
    %304 = arith.mulf %303, %248 : vector<2x12x12xf32>
    %305 = arith.addf %301, %304 : vector<2x12x12xf32>
    %c11_23 = arith.constant 11 : index
    %306 = memref.load %arg3[%c11_23] : memref<36xf32, #tpu.memory_space<smem>>
    %307 = vector.broadcast %306 : f32 to vector<2x12x12xf32>
    %308 = arith.mulf %307, %249 : vector<2x12x12xf32>
    %309 = arith.addf %305, %308 : vector<2x12x12xf32>
    %c12_24 = arith.constant 12 : index
    %310 = memref.load %arg3[%c12_24] : memref<36xf32, #tpu.memory_space<smem>>
    %311 = vector.broadcast %310 : f32 to vector<2x12x12xf32>
    %312 = arith.mulf %311, %250 : vector<2x12x12xf32>
    %313 = arith.addf %309, %312 : vector<2x12x12xf32>
    %c13_25 = arith.constant 13 : index
    %314 = memref.load %arg3[%c13_25] : memref<36xf32, #tpu.memory_space<smem>>
    %315 = vector.broadcast %314 : f32 to vector<2x12x12xf32>
    %316 = arith.mulf %315, %251 : vector<2x12x12xf32>
    %317 = arith.addf %313, %316 : vector<2x12x12xf32>
    %c14_26 = arith.constant 14 : index
    %318 = memref.load %arg3[%c14_26] : memref<36xf32, #tpu.memory_space<smem>>
    %319 = vector.broadcast %318 : f32 to vector<2x12x12xf32>
    %320 = arith.mulf %319, %252 : vector<2x12x12xf32>
    %321 = arith.addf %317, %320 : vector<2x12x12xf32>
    %c15_27 = arith.constant 15 : index
    %322 = memref.load %arg3[%c15_27] : memref<36xf32, #tpu.memory_space<smem>>
    %323 = vector.broadcast %322 : f32 to vector<2x12x12xf32>
    %324 = arith.mulf %323, %253 : vector<2x12x12xf32>
    %325 = arith.addf %321, %324 : vector<2x12x12xf32>
    %c16_28 = arith.constant 16 : index
    %326 = memref.load %arg3[%c16_28] : memref<36xf32, #tpu.memory_space<smem>>
    %327 = vector.broadcast %326 : f32 to vector<2x12x12xf32>
    %328 = arith.mulf %327, %254 : vector<2x12x12xf32>
    %329 = arith.addf %325, %328 : vector<2x12x12xf32>
    %c17_29 = arith.constant 17 : index
    %330 = memref.load %arg3[%c17_29] : memref<36xf32, #tpu.memory_space<smem>>
    %331 = vector.broadcast %330 : f32 to vector<2x12x12xf32>
    %332 = arith.mulf %331, %255 : vector<2x12x12xf32>
    %333 = arith.addf %329, %332 : vector<2x12x12xf32>
    %cst_30 = arith.constant 0.000000e+00 : f32
    %334 = vector.broadcast %cst_30 : f32 to vector<2x12x12xf32>
    %335 = arith.maximumf %333, %334 : vector<2x12x12xf32>
    %c2_31 = arith.constant 2 : index
    %336 = memref.load %arg4[%c2_31] : memref<4xf32, #tpu.memory_space<smem>>
    %337 = vector.broadcast %336 : f32 to vector<2x12x12xf32>
    %c18_32 = arith.constant 18 : index
    %338 = memref.load %arg3[%c18_32] : memref<36xf32, #tpu.memory_space<smem>>
    %339 = vector.broadcast %338 : f32 to vector<2x12x12xf32>
    %340 = arith.mulf %339, %247 : vector<2x12x12xf32>
    %341 = arith.addf %337, %340 : vector<2x12x12xf32>
    %c19_33 = arith.constant 19 : index
    %342 = memref.load %arg3[%c19_33] : memref<36xf32, #tpu.memory_space<smem>>
    %343 = vector.broadcast %342 : f32 to vector<2x12x12xf32>
    %344 = arith.mulf %343, %248 : vector<2x12x12xf32>
    %345 = arith.addf %341, %344 : vector<2x12x12xf32>
    %c20_34 = arith.constant 20 : index
    %346 = memref.load %arg3[%c20_34] : memref<36xf32, #tpu.memory_space<smem>>
    %347 = vector.broadcast %346 : f32 to vector<2x12x12xf32>
    %348 = arith.mulf %347, %249 : vector<2x12x12xf32>
    %349 = arith.addf %345, %348 : vector<2x12x12xf32>
    %c21_35 = arith.constant 21 : index
    %350 = memref.load %arg3[%c21_35] : memref<36xf32, #tpu.memory_space<smem>>
    %351 = vector.broadcast %350 : f32 to vector<2x12x12xf32>
    %352 = arith.mulf %351, %250 : vector<2x12x12xf32>
    %353 = arith.addf %349, %352 : vector<2x12x12xf32>
    %c22_36 = arith.constant 22 : index
    %354 = memref.load %arg3[%c22_36] : memref<36xf32, #tpu.memory_space<smem>>
    %355 = vector.broadcast %354 : f32 to vector<2x12x12xf32>
    %356 = arith.mulf %355, %251 : vector<2x12x12xf32>
    %357 = arith.addf %353, %356 : vector<2x12x12xf32>
    %c23_37 = arith.constant 23 : index
    %358 = memref.load %arg3[%c23_37] : memref<36xf32, #tpu.memory_space<smem>>
    %359 = vector.broadcast %358 : f32 to vector<2x12x12xf32>
    %360 = arith.mulf %359, %252 : vector<2x12x12xf32>
    %361 = arith.addf %357, %360 : vector<2x12x12xf32>
    %c24_38 = arith.constant 24 : index
    %362 = memref.load %arg3[%c24_38] : memref<36xf32, #tpu.memory_space<smem>>
    %363 = vector.broadcast %362 : f32 to vector<2x12x12xf32>
    %364 = arith.mulf %363, %253 : vector<2x12x12xf32>
    %365 = arith.addf %361, %364 : vector<2x12x12xf32>
    %c25_39 = arith.constant 25 : index
    %366 = memref.load %arg3[%c25_39] : memref<36xf32, #tpu.memory_space<smem>>
    %367 = vector.broadcast %366 : f32 to vector<2x12x12xf32>
    %368 = arith.mulf %367, %254 : vector<2x12x12xf32>
    %369 = arith.addf %365, %368 : vector<2x12x12xf32>
    %c26_40 = arith.constant 26 : index
    %370 = memref.load %arg3[%c26_40] : memref<36xf32, #tpu.memory_space<smem>>
    %371 = vector.broadcast %370 : f32 to vector<2x12x12xf32>
    %372 = arith.mulf %371, %255 : vector<2x12x12xf32>
    %373 = arith.addf %369, %372 : vector<2x12x12xf32>
    %cst_41 = arith.constant 0.000000e+00 : f32
    %374 = vector.broadcast %cst_41 : f32 to vector<2x12x12xf32>
    %375 = arith.maximumf %373, %374 : vector<2x12x12xf32>
    %c3_42 = arith.constant 3 : index
    %376 = memref.load %arg4[%c3_42] : memref<4xf32, #tpu.memory_space<smem>>
    %377 = vector.broadcast %376 : f32 to vector<2x12x12xf32>
    %c27_43 = arith.constant 27 : index
    %378 = memref.load %arg3[%c27_43] : memref<36xf32, #tpu.memory_space<smem>>
    %379 = vector.broadcast %378 : f32 to vector<2x12x12xf32>
    %380 = arith.mulf %379, %247 : vector<2x12x12xf32>
    %381 = arith.addf %377, %380 : vector<2x12x12xf32>
    %c28_44 = arith.constant 28 : index
    %382 = memref.load %arg3[%c28_44] : memref<36xf32, #tpu.memory_space<smem>>
    %383 = vector.broadcast %382 : f32 to vector<2x12x12xf32>
    %384 = arith.mulf %383, %248 : vector<2x12x12xf32>
    %385 = arith.addf %381, %384 : vector<2x12x12xf32>
    %c29_45 = arith.constant 29 : index
    %386 = memref.load %arg3[%c29_45] : memref<36xf32, #tpu.memory_space<smem>>
    %387 = vector.broadcast %386 : f32 to vector<2x12x12xf32>
    %388 = arith.mulf %387, %249 : vector<2x12x12xf32>
    %389 = arith.addf %385, %388 : vector<2x12x12xf32>
    %c30_46 = arith.constant 30 : index
    %390 = memref.load %arg3[%c30_46] : memref<36xf32, #tpu.memory_space<smem>>
    %391 = vector.broadcast %390 : f32 to vector<2x12x12xf32>
    %392 = arith.mulf %391, %250 : vector<2x12x12xf32>
    %393 = arith.addf %389, %392 : vector<2x12x12xf32>
    %c31_47 = arith.constant 31 : index
    %394 = memref.load %arg3[%c31_47] : memref<36xf32, #tpu.memory_space<smem>>
    %395 = vector.broadcast %394 : f32 to vector<2x12x12xf32>
    %396 = arith.mulf %395, %251 : vector<2x12x12xf32>
    %397 = arith.addf %393, %396 : vector<2x12x12xf32>
    %c32_48 = arith.constant 32 : index
    %398 = memref.load %arg3[%c32_48] : memref<36xf32, #tpu.memory_space<smem>>
    %399 = vector.broadcast %398 : f32 to vector<2x12x12xf32>
    %400 = arith.mulf %399, %252 : vector<2x12x12xf32>
    %401 = arith.addf %397, %400 : vector<2x12x12xf32>
    %c33_49 = arith.constant 33 : index
    %402 = memref.load %arg3[%c33_49] : memref<36xf32, #tpu.memory_space<smem>>
    %403 = vector.broadcast %402 : f32 to vector<2x12x12xf32>
    %404 = arith.mulf %403, %253 : vector<2x12x12xf32>
    %405 = arith.addf %401, %404 : vector<2x12x12xf32>
    %c34_50 = arith.constant 34 : index
    %406 = memref.load %arg3[%c34_50] : memref<36xf32, #tpu.memory_space<smem>>
    %407 = vector.broadcast %406 : f32 to vector<2x12x12xf32>
    %408 = arith.mulf %407, %254 : vector<2x12x12xf32>
    %409 = arith.addf %405, %408 : vector<2x12x12xf32>
    %c35_51 = arith.constant 35 : index
    %410 = memref.load %arg3[%c35_51] : memref<36xf32, #tpu.memory_space<smem>>
    %411 = vector.broadcast %410 : f32 to vector<2x12x12xf32>
    %412 = arith.mulf %411, %255 : vector<2x12x12xf32>
    %413 = arith.addf %409, %412 : vector<2x12x12xf32>
    %cst_52 = arith.constant 0.000000e+00 : f32
    %414 = vector.broadcast %cst_52 : f32 to vector<2x12x12xf32>
    %415 = arith.maximumf %413, %414 : vector<2x12x12xf32>
    %416 = vector.shape_cast %295 : vector<2x12x12xf32> to vector<2x1x12x12xf32>
    %417 = vector.shape_cast %335 : vector<2x12x12xf32> to vector<2x1x12x12xf32>
    %418 = vector.shape_cast %375 : vector<2x12x12xf32> to vector<2x1x12x12xf32>
    %419 = vector.shape_cast %415 : vector<2x12x12xf32> to vector<2x1x12x12xf32>
    %420 = tpu.concatenate %416, %417, %418, %419 in 1 : vector<2x1x12x12xf32>, vector<2x1x12x12xf32>, vector<2x1x12x12xf32>, vector<2x1x12x12xf32> -> vector<2x4x12x12xf32>
    %c0_53 = arith.constant 0 : index
    %c0_54 = arith.constant 0 : index
    %c0_55 = arith.constant 0 : index
    %c0_56 = arith.constant 0 : index
    %421 = vector.load %arg5[%c0_53, %c0_54, %c0_55, %c0_56] : memref<2x4x12x12xf32, #tpu.memory_space<vmem>>, vector<2x4x12x12xf32>
    tpu.vector_store %arg5[%c0_53, %c0_54, %c0_55, %c0_56], %420 {strides = array<i32>} : memref<2x4x12x12xf32, #tpu.memory_space<vmem>>, vector<2x4x12x12xf32>,
    return
  }
}

</mosaic_0001>

<bundles_post_ra>
// kernel: resnet_block_forward.1
= control target key start
LH: loop header
LB: loop body
LE: loop exit
PB: predicated region body
PF: predicated region fallthrough
CT: control target
= control target key end

     0   :  { %11 = vsyncpa [#allocation4], 0  ;;  %s3347_s0 = inlined_call_operand.hbm [shape: f32[2,4,16,16], index: 0, kind: input, shape index: {}]   ;;  %s3348_s1 = inlined_call_operand.vmem [shape: f32[36], index: 1, kind: input, shape index: {}]   ;;  %s3349_s2 = inlined_call_operand.<no memory space> [shape: f32[1], index: 2, kind: input, shape index: {}]   ;;  %s3350_s3 = inlined_call_operand.vmem [shape: f32[36], index: 3, kind: input, shape index: {}]   ;;  %s3351_s4 = inlined_call_operand.vmem [shape: f32[4], index: 4, kind: input, shape index: {}]   ;;  %s3352_s5 = inlined_call_operand.vmem [shape: f32[2,4,12,12], index: 5, kind: output, shape index: {}]  }
   0x1   :  { %12 = vsyncpa [#allocation5], 0 }
   0x2   :  { %13 = vsyncpa [#allocation8], 0  ;;  %s44_s20 = sshll.u32 %s3350_s3, 4  ;;  %s45_s20 = int_to_ptr.vmem [resolvable:$true] %s44_s20 }
   0x3   :  { %s2203_s21 = scalar_lea.vmem %s45_s20, 16  ;;  %p2208_p1 = scmp.lt.s32.totalorder %s45_s20, %s45_s20 }
   0x4   :  { %p2204_p0 = scmp.ne.s32.totalorder %s45_s20, %s2203_s21  ;;  %p2209_p2 = scmp.lt.s32.totalorder %s2203_s21, %s2203_s21 }
   0x6   :  { %p2210_p3 = por %p2209_p2, %p2208_p1 }
   0x8   :  { %p2211_p4 = pnand %p2210_p3, %p2204_p0 }
   0xa   :  { %2214 = shalt.err (!%p2211_p4)
}
   0xb   :  { %s2265_s22 = smov [#allocation7]   ;;  %s2266_s23 = smov [#allocation3]  }
   0xc   :  { %47 = dma.vmem_to_smem %s45_s20, 16, %s2265_s22, [#allocation8]  }
   0xd   :  { %s19_s24 = sshll.u32 %s2266_s23, 4  ;;  %s20_s24 = int_to_ptr.vmem [resolvable:$true] %s19_s24 }
   0xe   :  { %s2223_s25 = scalar_lea.vmem %s20_s24, 2048  ;;  %p2228_p6 = scmp.lt.s32.totalorder %s20_s24, %s20_s24 }
   0xf   :  { %p2224_p5 = scmp.ne.s32.totalorder %s20_s24, %s2223_s25  ;;  %p2229_p7 = scmp.lt.s32.totalorder %s2223_s25, %s2223_s25 }
  0x11   :  { %p2230_p8 = por %p2229_p7, %p2228_p6 }
  0x13   :  { %p2231_p9 = pnand %p2230_p8, %p2224_p5 }
  0x15   :  { %2234 = shalt.err (!%p2231_p9)
}
  0x16   :  { %s2267_s3 = smov 128   ;;  %s2268_s26 = smov 8  }
  0x17   :  { %25 = dma.hbm_to_vmem [thread:$0]  %s3347_s0, 2048, %s20_s24, [#allocation4], %s2267_s3, %s2267_s3, %s2268_s26  }
  0x18   :  { %s32_s6 = sshll.u32 %s3348_s1, 4  ;;  %s54_s9 = sshll.u32 %s3351_s4, 4  ;;  %s33_s6 = int_to_ptr.vmem [resolvable:$true] %s32_s6  ;;  %s55_s9 = int_to_ptr.vmem [resolvable:$true] %s54_s9 }
  0x19   :  { %s2235_s10 = scalar_lea.vmem %s33_s6, 16  ;;  %p2240_p11 = scmp.lt.s32.totalorder %s33_s6, %s33_s6 }
  0x1a   :  { %p2236_p10 = scmp.ne.s32.totalorder %s33_s6, %s2235_s10  ;;  %p2241_p12 = scmp.lt.s32.totalorder %s2235_s10, %s2235_s10 }
  0x1c   :  { %p2242_p13 = por %p2241_p12, %p2240_p11 }
  0x1e   :  { %p2243_p0 = pnand %p2242_p13, %p2236_p10 }
  0x20   :  { %2246 = shalt.err (!%p2243_p0)
}
  0x21   :  { %s2269_s11 = smov [#allocation6]   ;;  %s2247_s0 = scalar_lea.vmem %s55_s9, 16 }
  0x22   :  { %35 = dma.vmem_to_smem %s33_s6, 16, %s2269_s11, [#allocation5]  }
  0x23   :  { %p2248_p1 = scmp.ne.s32.totalorder %s55_s9, %s2247_s0  ;;  %p2252_p2 = scmp.lt.s32.totalorder %s55_s9, %s55_s9 }
  0x24   :  { %p2253_p3 = scmp.lt.s32.totalorder %s2247_s0, %s2247_s0 }
  0x26   :  { %p2254_p4 = por %p2253_p3, %p2252_p2 }
  0x28   :  { %p2255_p5 = pnand %p2254_p4, %p2248_p1 }
  0x2a   :  { %2258 = shalt.err (!%p2255_p5)
}
  0x2b   :  { %s2270_s1 = smov [#allocation9]  }
  0x2c   :  { %57 = dma.vmem_to_smem %s55_s9, 16, %s2270_s1, [#allocation8]  }
  0x2d   :  { %2259 = dma.done.wait [#allocation4], 2048  }
  0x2e   :  { %2260 = vsyncadd [#allocation4], 4294965248 }
  0x2f   :  { %2261 = dma.done.wait [#allocation5], 16  }
  0x30   :  { %2262 = vsyncadd [#allocation5], 4294967280 }
  0x31   :  { %2263 = dma.done.wait [#allocation8], 32  }
  0x32   :  { %2264 = vsyncadd [#allocation8], 4294967264 }
  0x33   :  { %70 = sfence }
  0x34   :  { %s2101_s4 = sld [smem:[#allocation6 + $0x1]]  ;;  %v2315_v0 = vld [vmem:[#allocation3 + $0x40] sm:$0xff]  ;;  %v2319_v3 = vld [vmem:[#allocation3 + $0x10] sm:$0xff]  ;;  %v2321_v4 = vld [vmem:[#allocation3 + $0x8] sm:$0xff]  ;;  %s2271_s14 = smov 127   ;;  %vm347_vm0 = vcmask 1046528  }
  0x35   :  { %s2102_s12 = sld [smem:[#allocation6 + $0xa]]  ;;  %v2317_v1 = vld [vmem:[#allocation3] sm:$0xff]  ;;  %v2329_v10 = vld [vmem:[#allocation3 + $0x48] sm:$0xff]  ;;  %v2331_v11 = vld [vmem:[#allocation3 + $0x18] sm:$0xff]  ;;  %s2272_s18 = smov 126   ;;  %vm700_vm1 = vcmask 1045504  }
  0x36   :  { %s2103_s13 = sld [smem:[#allocation6 + $0x13]]  ;;  %v2337_v14 = vld [vmem:[#allocation3 + $0x20] sm:$0xff]  ;;  %v2339_v16 = vld [vmem:[#allocation3 + $0x50] sm:$0xff]  ;;  %v2345_v19 = vld [vmem:[#allocation3 + $0x58] sm:$0xff]  ;;  %vm1045_vm2 = vcmask 111616   ;;  %vm1043_vm3 = vcmask 113664  }
  0x37   :  { %s2104_s15 = sld [smem:[#allocation6 + $0x1c]]  ;;  %v2347_v20 = vld [vmem:[#allocation3 + $0x28] sm:$0xff]  ;;  %v2353_v23 = vld [vmem:[#allocation3 + $0x30] sm:$0xff]  ;;  %v2355_v25 = vld [vmem:[#allocation3 + $0x60] sm:$0xff]  ;;  %vm2075_vm4 = vcmask 93184   ;;  %vm2073_vm5 = vcmask 97280  }
  0x38   :  { %3355 = vst [vmem:[#allocation13_spill] sm:$0xff] %v2347_v20  ;;  %3356 = vst [vmem:[#allocation14_spill] sm:$0xff] %v2355_v25  ;;  %s2105_s16 = sld [smem:[#allocation6 + $0x2]]  ;;  %v2361_v28 = vld [vmem:[#allocation3 + $0x68] sm:$0xff]  ;;  %v2363_v29 = vld [vmem:[#allocation3 + $0x38] sm:$0xff] }
  0x39   :  { %v2369_v33 = vld [vmem:[#allocation3 + $0x70] sm:$0xff]  ;;  %s2106_s17 = sld [smem:[#allocation6 + $0xb]]  ;;  %v2375_v36 = vld [vmem:[#allocation3 + $0x78] sm:$0xff] }
  0x3a   :  { %v130_v2 = vstv %s2101_s4  ;;  %s2107_s19 = sld [smem:[#allocation6 + $0x14]] }
  0x3b   :  { %v133_v5 = vmul.f32 %v130_v2, %v2315_v0  ;;  %v131_v6 = vmul.f32 %v130_v2, %v2317_v1  ;;  %v156_v7 = vstv %s2102_s12  ;;  %v132_v9 = vmul.f32 %v130_v2, %v2321_v4  ;;  %s2108_s20 = sld [smem:[#allocation6 + $0x1d]] }
  0x3c   :  { %v157_v8 = vmul.f32 %v156_v7, %v2319_v3  ;;  %v134_v12 = vmul.f32 %v130_v2, %v2329_v10  ;;  %v158_v13 = vmul.f32 %v156_v7, %v2331_v11  ;;  %v182_v15 = vstv %s2103_s13  ;;  %s2113_s21 = sld [smem:[#allocation6 + $0x4]] }
  0x3d   :  { %143 = vrot.lane.b32.xlu1 %v133_v5, %s2271_s14  ;;  %139 = vrot.lane.b32.xlu0 %v131_v6, %s2271_s14  ;;  %v183_v17 = vmul.f32 %v182_v15, %v2337_v14  ;;  %v159_v18 = vmul.f32 %v156_v7, %v2339_v16  ;;  %v160_v21 = vmul.f32 %v156_v7, %v2345_v19  ;;  %v208_v24 = vstv %s2104_s15  ;;  %s2114_s22 = sld [smem:[#allocation6 + $0xd]] }
  0x3e   :  { %v184_v22 = vmul.f32 %v182_v15, %v2347_v20  ;;  %v209_v26 = vmul.f32 %v208_v24, %v2353_v23  ;;  %v185_v27 = vmul.f32 %v182_v15, %v2355_v25  ;;  %v186_v30 = vmul.f32 %v182_v15, %v2361_v28  ;;  %s2115_s23 = sld [smem:[#allocation6 + $0x16]] }
  0x3f   :  { %v210_v31 = vmul.f32 %v208_v24, %v2363_v29  ;;  %v234_v32 = vstv %s2105_s16  ;;  %v211_v35 = vmul.f32 %v208_v24, %v2369_v33  ;;  %v212_v37 = vmul.f32 %v208_v24, %v2375_v36  ;;  %s2116_s24 = sld [smem:[#allocation6 + $0x1f]] }
  0x40   :  { %v235_v34 = vmul.f32 %v234_v32, %v2317_v1  ;;  %v236_v38 = vmul.f32 %v234_v32, %v2321_v4  ;;  %v260_v39 = vstv %s2106_s17  ;;  %v237_v41 = vmul.f32 %v234_v32, %v2315_v0  ;;  %s2117_s25 = sld [smem:[#allocation6 + $0x5]] }
  0x41   :  { %165 = vrot.lane.b32.xlu1 %v157_v8, %s2271_s14  ;;  %141 = vrot.lane.b32.xlu0 %v132_v9, %s2271_s14  ;;  %v261_v40 = vmul.f32 %v260_v39, %v2319_v3  ;;  %v238_v42 = vmul.f32 %v234_v32, %v2329_v10  ;;  %v262_v43 = vmul.f32 %v260_v39, %v2331_v11  ;;  %v286_v44 = vstv %s2107_s19  ;;  %s2118_s3 = sld [smem:[#allocation6 + $0xe]] }
  0x42   :  { %v287_v45 = vmul.f32 %v286_v44, %v2337_v14  ;;  %v263_v46 = vmul.f32 %v260_v39, %v2339_v16  ;;  %v264_v47 = vmul.f32 %v260_v39, %v2345_v19  ;;  %v288_v48 = vmul.f32 %v286_v44, %v2347_v20  ;;  %s2119_s26 = sld [smem:[#allocation6 + $0x17]] }
  0x43   :  { %v312_v49 = vstv %s2108_s20  ;;  %v289_v51 = vmul.f32 %v286_v44, %v2355_v25  ;;  %v435_v52 = vstv %s2113_s21  ;;  %v290_v53 = vmul.f32 %v286_v44, %v2361_v28  ;;  %s2120_s27 = sld [smem:[#allocation6 + $0x20]] }
  0x44   :  { %v313_v50 = vmul.f32 %v312_v49, %v2353_v23  ;;  %v314_v54 = vmul.f32 %v312_v49, %v2363_v29  ;;  %v437_v55 = vmul.f32 %v435_v52, %v2321_v4  ;;  %v436_v56 = vmul.f32 %v435_v52, %v2317_v1  ;;  %s2125_s28 = sld [smem:[#allocation6 + $0x7]] }
  0x45   :  { %145 = vrot.lane.b32.xlu1 %v134_v12, %s2271_s14  ;;  %167 = vrot.lane.b32.xlu0 %v158_v13, %s2271_s14  ;;  %v467_v57 = vstv %s2114_s22  ;;  %v316_v58 = vmul.f32 %v312_v49, %v2375_v36  ;;  %v315_v59 = vmul.f32 %v312_v49, %v2369_v33  ;;  %v438_v61 = vmul.f32 %v435_v52, %v2315_v0  ;;  %s2126_s29 = sld [smem:[#allocation6 + $0x10]] }
  0x46   :  { %v468_v60 = vmul.f32 %v467_v57, %v2319_v3  ;;  %v445_v62 = vrot.slane %v437_v55, 1  ;;  %v444_v63 = vrot.slane %v436_v56, 1  ;;  %v469_v2 = vmul.f32 %v467_v57, %v2331_v11  ;;  %s2127_s30 = sld [smem:[#allocation6 + $0x19]] }
  0x47   :  { %v439_v5 = vmul.f32 %v435_v52, %v2329_v10  ;;  %v447_v6 = vrot.slane %v438_v61, 1  ;;  %v499_v7 = vstv %s2115_s23  ;;  %v471_v24 = vmul.f32 %v467_v57, %v2345_v19  ;;  %s2128_s6 = sld [smem:[#allocation6 + $0x22]] }
  0x48   :  { %v446_v8 = vsel %vm347_vm0, %v444_v63, %v445_v62  ;;  %v476_v9 = vrot.slane %v468_v60, 1  ;;  %v477_v12 = vrot.slane %v469_v2, 1  ;;  %v500_v15 = vmul.f32 %v499_v7, %v2337_v14  ;;  %s2129_s7 = sld [smem:[#allocation6 + $0x8]] }
  0x49   :  { %191 = vrot.lane.b32.xlu1 %v183_v17, %s2271_s14  ;;  %169 = vrot.lane.b32.xlu0 %v159_v18, %s2271_s14  ;;  %v448_v13 = vrot.slane %v439_v5, 1  ;;  %v501_v17 = vmul.f32 %v499_v7, %v2347_v20  ;;  %v531_v32 = vstv %s2116_s24  ;;  %v502_v39 = vmul.f32 %v499_v7, %v2355_v25  ;;  %s2130_s8 = sld [smem:[#allocation6 + $0x11]] }
  0x4a   :  { %v478_v18 = vsel %vm347_vm0, %v476_v9, %v477_v12  ;;  %v595_v56 = vstv %s2118_s3  ;;  %s2131_s9 = sld [smem:[#allocation6 + $0x1a]] }
  0x4b   :  { %v511_v44 = vrot.slane %v502_v39, 1  ;;  %s2132_s10 = sld [smem:[#allocation6 + $0x23]] }
  0x4c   :  { %s89_s11 = sld [smem:[#allocation6]] }
  0x4d   :  { %171 = vrot.lane.b32.xlu1 %v160_v21, %s2271_s14  ;;  %193 = vrot.lane.b32.xlu0 %v184_v22, %s2271_s14  ;;  %v449_v21 = vsel %vm347_vm0, %v447_v6, %v448_v13  ;;  %v470_v22 = vmul.f32 %v467_v57, %v2339_v16  ;;  %v596_v57 = vmul.f32 %v595_v56, %v2319_v3  ;;  %s2098_s0 = sld [smem:[#allocation6 + $0x9]] }
  0x4e   :  { %s2099_s1 = sld [smem:[#allocation6 + $0x12]] }
  0x4f   :  { %v604_v63 = vrot.slane %v596_v57, 1  ;;  %s2100_s4 = sld [smem:[#allocation6 + $0x1b]] }
  0x50   :  { %s2110_s15 = sld [smem:[#allocation6 + $0xc]] }
  0x51   :  { %217 = vrot.lane.b32.xlu1 %v209_v26, %s2271_s14  ;;  %195 = vrot.lane.b32.xlu0 %v185_v27, %s2271_s14  ;;  %v508_v26 = vrot.slane %v500_v15, 1  ;;  %v509_v27 = vrot.slane %v501_v17, 1  ;;  %s2703_s16 = sld [smem:[#allocation6 + $0x15]] }
  0x52   :  { %s2719_s17 = sld [smem:[#allocation6 + $0x1e]] }
  0x53   :  { %s2121_s19 = sld [smem:[#allocation6 + $0x6]] }
  0x54   :  { %s2122_s20 = sld [smem:[#allocation6 + $0xf]] }
  0x55   :  { %197 = vrot.lane.b32.xlu1 %v186_v30, %s2271_s14  ;;  %219 = vrot.lane.b32.xlu0 %v210_v31, %s2271_s14  ;;  %v479_v30 = vrot.slane %v470_v22, 1  ;;  %v480_v31 = vrot.slane %v471_v24, 1  ;;  %s2805_s21 = sld [smem:[#allocation6 + $0x18]] }
  0x56   :  { %s2819_s22 = sld [smem:[#allocation6 + $0x21]] }
  0x57   :  { %s2146_s12 = sld [smem:[#allocation7 + $0xd]] }
  0x58   :  { %s2147_s13 = sld [smem:[#allocation7 + $0xe]] }
  0x59   :  { %243 = vrot.lane.b32.xlu1 %v235_v34, %s2272_s18  ;;  %221 = vrot.lane.b32.xlu0 %v211_v35, %s2271_s14  ;;  %v532_v34 = vmul.f32 %v531_v32, %v2353_v23  ;;  %v533_v35 = vmul.f32 %v531_v32, %v2363_v29 }
  0x5d   :  { %223 = vrot.lane.b32.xlu1 %v212_v37, %s2271_s14  ;;  %245 = vrot.lane.b32.xlu0 %v236_v38, %s2272_s18  ;;  %v510_v37 = vsel %vm347_vm0, %v508_v26, %v509_v27  ;;  %v481_v38 = vsel %vm347_vm0, %v479_v30, %v480_v31  ;;  %v659_v26 = vstv %s2120_s27  ;;  %s2133_s27 = sld [smem:[#allocation7 + $0x1]] }
  0x61   :  { %269 = vrot.lane.b32.xlu1 %v261_v40, %s2272_s18  ;;  %247 = vrot.lane.b32.xlu0 %v237_v41, %s2272_s18  ;;  %v503_v40 = vmul.f32 %v499_v7, %v2361_v28  ;;  %v563_v41 = vstv %s2117_s25  ;;  %v627_v7 = vstv %s2119_s26 }
  0x62   :  { %v566_v61 = vmul.f32 %v563_v41, %v2315_v0  ;;  %v628_v9 = vmul.f32 %v627_v7, %v2337_v14 }
  0x64   :  { %v575_v5 = vrot.slane %v566_v61, 1 }
  0x65   :  { %249 = vrot.lane.b32.xlu1 %v238_v42, %s2272_s18  ;;  %271 = vrot.lane.b32.xlu0 %v262_v43, %s2272_s18  ;;  %v540_v42 = vrot.slane %v532_v34, 1  ;;  %v541_v43 = vrot.slane %v533_v35, 1  ;;  %v630_v34 = vmul.f32 %v627_v7, %v2355_v25  ;;  %v631_v35 = vmul.f32 %v627_v7, %v2361_v28 }
  0x67   :  { %v639_v39 = vrot.slane %v630_v34, 1 }
  0x69   :  { %295 = vrot.lane.b32.xlu1 %v287_v45, %s2272_s18  ;;  %273 = vrot.lane.b32.xlu0 %v263_v46, %s2272_s18  ;;  %v512_v45 = vrot.slane %v503_v40, 1  ;;  %v564_v46 = vmul.f32 %v563_v41, %v2317_v1  ;;  %v640_v40 = vrot.slane %v631_v35, 1  ;;  %v884_v35 = vstv %s2128_s6  ;;  %s2144_s6 = sld [smem:[#allocation7 + $0xb]] }
  0x6b   :  { %v513_v49 = vsel %vm347_vm0, %v511_v44, %v512_v45  ;;  %v572_v52 = vrot.slane %v564_v46, 1  ;;  %v641_v44 = vsel %vm347_vm0, %v639_v39, %v640_v40  ;;  %v885_v39 = vmul.f32 %v884_v35, %v2353_v23 }
  0x6d   :  { %275 = vrot.lane.b32.xlu1 %v264_v47, %s2272_s18  ;;  %297 = vrot.lane.b32.xlu0 %v288_v48, %s2272_s18  ;;  %v565_v47 = vmul.f32 %v563_v41, %v2321_v4  ;;  %v542_v48 = vsel %vm347_vm0, %v540_v42, %v541_v43  ;;  %v662_v42 = vmul.f32 %v659_v26, %v2369_v33 }
  0x71   :  { %321 = vrot.lane.b32.xlu1 %v313_v50, %s2272_s18  ;;  %299 = vrot.lane.b32.xlu0 %v289_v51, %s2272_s18  ;;  %v534_v50 = vmul.f32 %v531_v32, %v2369_v33  ;;  %v535_v51 = vmul.f32 %v531_v32, %v2375_v36  ;;  %v661_v32 = vmul.f32 %v659_v26, %v2363_v29 }
  0x73   :  { %v544_v55 = vrot.slane %v535_v51, 1 }
  0x75   :  { %301 = vrot.lane.b32.xlu1 %v290_v53, %s2272_s18  ;;  %323 = vrot.lane.b32.xlu0 %v314_v54, %s2272_s18  ;;  %v573_v53 = vrot.slane %v565_v47, 1  ;;  %v543_v54 = vrot.slane %v534_v50, 1 }
  0x77   :  { %v545_v60 = vsel %vm347_vm0, %v543_v54, %v544_v55  ;;  %v820_v54 = vstv %s2126_s29  ;;  %s2134_s29 = sld [smem:[#allocation7 + $0x2]] }
  0x79   :  { %327 = vrot.lane.b32.xlu1 %v316_v58, %s2272_s18  ;;  %325 = vrot.lane.b32.xlu0 %v315_v59, %s2272_s18  ;;  %v597_v58 = vmul.f32 %v595_v56, %v2331_v11  ;;  %v574_v59 = vsel %vm347_vm0, %v572_v52, %v573_v53 }
  0x7b   :  { %v605_v2 = vrot.slane %v597_v58, 1 }
  0x7d   :  { %452 = vrot.lane.b32.xlu1 %v445_v62, %s2271_s14  ;;  %450 = vrot.lane.b32.xlu0 %v446_v8, %s2271_s14  ;;  %v567_v62 = vmul.f32 %v563_v41, %v2329_v10  ;;  %v598_v8 = vmul.f32 %v595_v56, %v2339_v16  ;;  %v606_v15 = vsel %vm347_vm0, %v604_v63, %v605_v2 }
  0x7e   :  { %v663_v41 = vmul.f32 %v659_v26, %v2375_v36 }
  0x7f   :  { %v576_v6 = vrot.slane %v567_v62, 1  ;;  %v607_v22 = vrot.slane %v598_v8, 1 }
  0x81   :  { %482 = vrot.lane.b32.xlu1 %v478_v18, %s2271_s14  ;;  %454 = vrot.lane.b32.xlu0 %v449_v21, %s2271_s14  ;;  %v577_v17 = vsel %vm347_vm0, %v575_v5, %v576_v6  ;;  %v636_v18 = vrot.slane %v628_v9, 1  ;;  %v852_v5 = vstv %s2127_s30  ;;  %s2143_s30 = sld [smem:[#allocation7 + $0xa]] }
  0x85   :  { %456 = vrot.lane.b32.xlu1 %v448_v13, %s2271_s14  ;;  %484 = vrot.lane.b32.xlu0 %v477_v12, %s2271_s14  ;;  %v629_v12 = vmul.f32 %v627_v7, %v2347_v20  ;;  %v599_v13 = vmul.f32 %v595_v56, %v2345_v19 }
  0x87   :  { %v637_v21 = vrot.slane %v629_v12, 1  ;;  %v608_v24 = vrot.slane %v599_v13, 1 }
  0x89   :  { %514 = vrot.lane.b32.xlu1 %v510_v37, %s2271_s14  ;;  %486 = vrot.lane.b32.xlu0 %v481_v38, %s2271_s14  ;;  %v609_v30 = vsel %vm347_vm0, %v607_v22, %v608_v24  ;;  %v669_v38 = vrot.slane %v661_v32, 1  ;;  %v823_v22 = vmul.f32 %v820_v54, %v2339_v16 }
  0x8b   :  { %v832_v32 = vrot.slane %v823_v22, 2 }
  0x8d   :  { %488 = vrot.lane.b32.xlu1 %v480_v31, %s2271_s14  ;;  %516 = vrot.lane.b32.xlu0 %v509_v27, %s2271_s14  ;;  %v638_v27 = vsel %vm347_vm0, %v636_v18, %v637_v21  ;;  %v660_v31 = vmul.f32 %v659_v26, %v2353_v23 }
  0x8f   :  { %v668_v37 = vrot.slane %v660_v31, 1 }
  0x91   :  { %546 = vrot.lane.b32.xlu1 %v542_v48, %s2271_s14  ;;  %518 = vrot.lane.b32.xlu0 %v513_v49, %s2271_s14  ;;  %v672_v48 = vrot.slane %v663_v41, 1  ;;  %v671_v49 = vrot.slane %v662_v42, 1 }
  0x95   :  { %520 = vrot.lane.b32.xlu1 %v512_v45, %s2271_s14  ;;  %548 = vrot.lane.b32.xlu0 %v541_v43, %s2271_s14  ;;  %v670_v43 = vsel %vm347_vm0, %v668_v37, %v669_v38  ;;  %v788_v45 = vstv %s2125_s28 }
  0x96   :  { %v790_v50 = vmul.f32 %v788_v45, %v2321_v4  ;;  %v789_v51 = vmul.f32 %v788_v45, %v2317_v1  ;;  %v791_v57 = vmul.f32 %v788_v45, %v2315_v0  ;;  %v792_v61 = vmul.f32 %v788_v45, %v2329_v10 }
  0x98   :  { %v798_v56 = vrot.slane %v790_v50, 2  ;;  %v797_v58 = vrot.slane %v789_v51, 2  ;;  %v801_v9 = vrot.slane %v792_v61, 2  ;;  %v893_v50 = vrot.slane %v885_v39, 2 }
  0x99   :  { %578 = vrot.lane.b32.xlu1 %v574_v59, %s2272_s18  ;;  %550 = vrot.lane.b32.xlu0 %v545_v60, %s2271_s14  ;;  %v821_v59 = vmul.f32 %v820_v54, %v2319_v3  ;;  %v822_v60 = vmul.f32 %v820_v54, %v2331_v11 }
  0x9b   :  { %v829_v7 = vrot.slane %v821_v59, 2  ;;  %v830_v8 = vrot.slane %v822_v60, 2  ;;  %v887_v59 = vmul.f32 %v884_v35, %v2369_v33 }
  0x9d   :  { %552 = vrot.lane.b32.xlu1 %v544_v55, %s2271_s14  ;;  %580 = vrot.lane.b32.xlu0 %v573_v53, %s2272_s18  ;;  %v673_v55 = vsel %vm347_vm0, %v671_v49, %v672_v48  ;;  %v831_v18 = vsel %vm700_vm1, %v829_v7, %v830_v8 }
  0xa1   :  { %610 = vrot.lane.b32.xlu1 %v606_v15, %s2272_s18  ;;  %582 = vrot.lane.b32.xlu0 %v577_v17, %s2272_s18  ;;  %v853_v15 = vmul.f32 %v852_v5, %v2337_v14  ;;  %v854_v17 = vmul.f32 %v852_v5, %v2347_v20 }
  0xa3   :  { %v862_v31 = vrot.slane %v854_v17, 2 }
  0xa5   :  { %584 = vrot.lane.b32.xlu1 %v576_v6, %s2272_s18  ;;  %612 = vrot.lane.b32.xlu0 %v605_v2, %s2272_s18  ;;  %v800_v2 = vrot.slane %v791_v57, 2  ;;  %v799_v6 = vsel %vm700_vm1, %v797_v58, %v798_v56 }
  0xa9   :  { %642 = vrot.lane.b32.xlu1 %v638_v27, %s2272_s18  ;;  %614 = vrot.lane.b32.xlu0 %v609_v30, %s2272_s18  ;;  %v861_v30 = vrot.slane %v853_v15, 2 }
  0xab   :  { %v863_v41 = vsel %vm700_vm1, %v861_v30, %v862_v31 }
  0xad   :  { %616 = vrot.lane.b32.xlu1 %v608_v24, %s2272_s18  ;;  %644 = vrot.lane.b32.xlu0 %v637_v21, %s2272_s18  ;;  %v802_v21 = vsel %vm700_vm1, %v800_v2, %v801_v9  ;;  %v824_v24 = vmul.f32 %v820_v54, %v2345_v19 }
  0xaf   :  { %v2484_v46 = vpop.permute.xlu1 %143  ;;  %v2486_v47 = vpop.permute.xlu0 %139  ;;  %v833_v34 = vrot.slane %v824_v24, 2 }
  0xb1   :  { %674 = vrot.lane.b32.xlu1 %v670_v43, %s2272_s18  ;;  %646 = vrot.lane.b32.xlu0 %v641_v44, %s2272_s18  ;;  %v834_v42 = vsel %vm700_vm1, %v832_v32, %v833_v34  ;;  %v886_v43 = vmul.f32 %v884_v35, %v2363_v29  ;;  %v856_v44 = vmul.f32 %v852_v5, %v2361_v28 }
  0xb3   :  { %v2492_v52 = vpop.permute.xlu1 %165  ;;  %v2494_v53 = vpop.permute.xlu0 %141  ;;  %v894_v51 = vrot.slane %v886_v43, 2  ;;  %v865_v54 = vrot.slane %v856_v44, 2 }
  0xb5   :  { %648 = vrot.lane.b32.xlu1 %v640_v40, %s2272_s18  ;;  %676 = vrot.lane.b32.xlu0 %v669_v38, %s2272_s18  ;;  %v855_v40 = vmul.f32 %v852_v5, %v2355_v25  ;;  %v895_v60 = vsel %vm700_vm1, %v893_v50, %v894_v51  ;;  %v888_v5 = vmul.f32 %v884_v35, %v2375_v36 }
  0xb7   :  { %v2503_v62 = vpop.permute.xlu1 %145  ;;  %v2505_v63 = vpop.permute.xlu0 %167  ;;  %v864_v49 = vrot.slane %v855_v40, 2  ;;  %v897_v17 = vrot.slane %v888_v5, 2 }
  0xb9   :  { %680 = vrot.lane.b32.xlu1 %v672_v48, %s2272_s18  ;;  %678 = vrot.lane.b32.xlu0 %v673_v55, %s2272_s18  ;;  %v916_v55 = vstv %s2129_s7  ;;  %v866_v61 = vsel %vm700_vm1, %v864_v49, %v865_v54  ;;  %v980_v49 = vstv %s2131_s9  ;;  %s2153_s7 = sld [smem:[#allocation7 + $0x13]] }
  0xba   :  { %v917_v58 = vmul.f32 %v916_v55, %v2317_v1  ;;  %v918_v2 = vmul.f32 %v916_v55, %v2321_v4  ;;  %v920_v35 = vmul.f32 %v916_v55, %v2329_v10  ;;  %s2163_s9 = sld [smem:[#allocation7 + $0x1c]] }
  0xbb   :  { %v2510_v12 = vpop.permute.xlu1 %191  ;;  %v2512_v13 = vpop.permute.xlu0 %169 }
  0xbc   :  { %v926_v15 = vrot.slane %v918_v2, 2  ;;  %v929_v44 = vrot.slane %v920_v35, 2 }
  0xbd   :  { %805 = vrot.lane.b32.xlu1 %v798_v56, %s2271_s14  ;;  %803 = vrot.lane.b32.xlu0 %v799_v6, %s2271_s14 }
  0xbf   :  { %v2522_v26 = vpop.permute.xlu1 %171  ;;  %v2524_v27 = vpop.permute.xlu0 %193 }
  0xc1   :  { %835 = vrot.lane.b32.xlu1 %v831_v18, %s2271_s14  ;;  %807 = vrot.lane.b32.xlu0 %v802_v21, %s2271_s14  ;;  %v948_v18 = vstv %s2130_s8  ;;  %s2154_s8 = sld [smem:[#allocation7 + $0x14]] }
  0xc2   :  { %v949_v24 = vmul.f32 %v948_v18, %v2319_v3  ;;  %v950_v30 = vmul.f32 %v948_v18, %v2331_v11 }
  0xc3   :  { %v2528_v37 = vpop.permute.xlu1 %217  ;;  %v2530_v38 = vpop.permute.xlu0 %195 }
  0xc5   :  { %809 = vrot.lane.b32.xlu1 %v801_v9, %s2271_s14  ;;  %837 = vrot.lane.b32.xlu0 %v830_v8, %s2271_s14  ;;  %v896_v8 = vrot.slane %v887_v59, 2  ;;  %v925_v9 = vrot.slane %v917_v58, 2  ;;  %v982_v58 = vmul.f32 %v980_v49, %v2347_v20  ;;  %v952_v59 = vmul.f32 %v948_v18, %v2345_v19 }
  0xc7   :  { %v2540_v45 = vpop.permute.xlu1 %197  ;;  %v2542_v48 = vpop.permute.xlu0 %219  ;;  %v898_v32 = vsel %vm700_vm1, %v896_v8, %v897_v17 }
  0xc9   :  { %867 = vrot.lane.b32.xlu1 %v863_v41, %s2271_s14  ;;  %839 = vrot.lane.b32.xlu0 %v834_v42, %s2271_s14  ;;  %v957_v41 = vrot.slane %v949_v24, 2  ;;  %v958_v42 = vrot.slane %v950_v30, 2 }
  0xcb   :  { %v2546_v56 = vpop.permute.xlu1 %243  ;;  %v2548_v57 = vpop.permute.xlu0 %221 }
  0xcd   :  { %841 = vrot.lane.b32.xlu1 %v833_v34, %s2271_s14  ;;  %869 = vrot.lane.b32.xlu0 %v862_v31, %s2271_s14  ;;  %v927_v31 = vsel %vm700_vm1, %v925_v9, %v926_v15  ;;  %v919_v34 = vmul.f32 %v916_v55, %v2315_v0  ;;  %v981_v55 = vmul.f32 %v980_v49, %v2337_v14  ;;  %v990_v9 = vrot.slane %v982_v58, 2 }
  0xcf   :  { %v2558_v6 = vpop.permute.xlu1 %223  ;;  %v2560_v7 = vpop.permute.xlu0 %245  ;;  %v928_v43 = vrot.slane %v919_v34, 2  ;;  %v989_v8 = vrot.slane %v981_v55, 2 }
  0xd1   :  { %899 = vrot.lane.b32.xlu1 %v895_v60, %s2271_s14  ;;  %871 = vrot.lane.b32.xlu0 %v866_v61, %s2271_s14  ;;  %v959_v60 = vsel %vm700_vm1, %v957_v41, %v958_v42  ;;  %v930_v61 = vsel %vm700_vm1, %v928_v43, %v929_v44  ;;  %v983_v41 = vmul.f32 %v980_v49, %v2355_v25 }
  0xd2   :  { %v984_v43 = vmul.f32 %v980_v49, %v2361_v28 }
  0xd3   :  { %v2564_v21 = vpop.permute.xlu1 %269  ;;  %v2566_v22 = vpop.permute.xlu0 %247  ;;  %v992_v58 = vrot.slane %v983_v41, 2 }
  0xd5   :  { %873 = vrot.lane.b32.xlu1 %v865_v54, %s2271_s14  ;;  %901 = vrot.lane.b32.xlu0 %v894_v51, %s2271_s14  ;;  %v951_v54 = vmul.f32 %v948_v18, %v2339_v16  ;;  %v1012_v18 = vstv %s2132_s10  ;;  %s2164_s10 = sld [smem:[#allocation7 + $0x1d]] }
  0xd6   :  { %v1013_v34 = vmul.f32 %v1012_v18, %v2353_v23  ;;  %v1014_v35 = vmul.f32 %v1012_v18, %v2363_v29 }
  0xd7   :  { %v2576_v39 = vpop.permute.xlu1 %249  ;;  %v2578_v40 = vpop.permute.xlu0 %271 }
  0xd9   :  { %931 = vrot.lane.b32.xlu1 %v927_v31, %s2272_s18  ;;  %903 = vrot.lane.b32.xlu0 %v898_v32, %s2271_s14  ;;  %v991_v31 = vsel %vm700_vm1, %v989_v8, %v990_v9 }
  0xdb   :  { %v2582_v50 = vpop.permute.xlu1 %295  ;;  %v2584_v51 = vpop.permute.xlu0 %273 }
  0xdc   :  { %3357 = vst [vmem:[#allocation15_spill] sm:$0xff] %v2582_v50 }
  0xdd   :  { %905 = vrot.lane.b32.xlu1 %v897_v17, %s2271_s14  ;;  %933 = vrot.lane.b32.xlu0 %v926_v15, %s2272_s18  ;;  %v960_v15 = vrot.slane %v951_v54, 2  ;;  %v961_v17 = vrot.slane %v952_v59, 2  ;;  %v993_v59 = vrot.slane %v984_v43, 2 }
  0xdf   :  { %v2594_v2 = vpop.permute.xlu1 %275  ;;  %v2596_v5 = vpop.permute.xlu0 %297  ;;  %v962_v32 = vsel %vm700_vm1, %v960_v15, %v961_v17  ;;  %v994_v8 = vsel %vm700_vm1, %v992_v58, %v993_v59  ;;  %v1016_v15 = vmul.f32 %v1012_v18, %v2375_v36 }
  0xe0   :  { %3358 = vst [vmem:[#allocation16_spill] sm:$0xff] %v2594_v2 }
  0xe1   :  { %963 = vrot.lane.b32.xlu1 %v959_v60, %s2272_s18  ;;  %935 = vrot.lane.b32.xlu0 %v930_v61, %s2272_s18 }
  0xe3   :  { %v2600_v24 = vpop.permute.xlu1 %321  ;;  %v2602_v30 = vpop.permute.xlu0 %299 }
  0xe4   :  { %3359 = vst [vmem:[#allocation17_spill] sm:$0xff] %v2600_v24  ;;  %3360 = vst [vmem:[#allocation18_spill] sm:$0xff] %v2602_v30  ;;  %v120_v24 = vstv %s2100_s4  ;;  %s2140_s4 = sld [smem:[#allocation7 + $0x8]] }
  0xe5   :  { %937 = vrot.lane.b32.xlu1 %v929_v44, %s2272_s18  ;;  %965 = vrot.lane.b32.xlu0 %v958_v42, %s2272_s18  ;;  %v1021_v42 = vrot.slane %v1013_v34, 2  ;;  %v1022_v44 = vrot.slane %v1014_v35, 2  ;;  %v1025_v35 = vrot.slane %v1016_v15, 2  ;;  %v122_v50 = vmul.f32 %v120_v24, %v2363_v29 }
  0xe7   :  { %v2612_v54 = vpop.permute.xlu1 %301  ;;  %v2614_v55 = vpop.permute.xlu0 %323  ;;  %v1023_v49 = vsel %vm700_vm1, %v1021_v42, %v1022_v44 }
  0xe8   :  { %3361 = vst [vmem:[#allocation19_spill] sm:$0xff] %v2612_v54 }
  0xe9   :  { %995 = vrot.lane.b32.xlu1 %v991_v31, %s2272_s18  ;;  %967 = vrot.lane.b32.xlu0 %v962_v32, %s2272_s18  ;;  %v1015_v31 = vmul.f32 %v1012_v18, %v2369_v33 }
  0xeb   :  { %v2618_v60 = vpop.permute.xlu1 %327  ;;  %v2620_v61 = vpop.permute.xlu0 %325 }
  0xec   :  { %3362 = vst [vmem:[#allocation20_spill] sm:$0xff] %v2618_v60  ;;  %3363 = vst [vmem:[#allocation21_spill] sm:$0xff] %v2620_v61 }
  0xed   :  { %969 = vrot.lane.b32.xlu1 %v961_v17, %s2272_s18  ;;  %997 = vrot.lane.b32.xlu0 %v990_v9, %s2272_s18  ;;  %v1024_v17 = vrot.slane %v1015_v31, 2 }
  0xef   :  { %v2628_v32 = vpop.permute.xlu1 %452  ;;  %v2630_v34 = vpop.permute.xlu0 %450  ;;  %v1026_v18 = vsel %vm700_vm1, %v1024_v17, %v1025_v35 }
  0xf0   :  { %3364 = vst [vmem:[#allocation22_spill] sm:$0xff] %v2628_v32  ;;  %3365 = vst [vmem:[#allocation23_spill] sm:$0xff] %v2630_v34 }
  0xf1   :  { %1027 = vrot.lane.b32.xlu1 %v1023_v49, %s2272_s18  ;;  %999 = vrot.lane.b32.xlu0 %v994_v8, %s2272_s18 }
  0xf3   :  { %v2634_v41 = vpop.permute.xlu1 %482  ;;  %v2636_v9 = vpop.permute.xlu0 %454 }
  0xf4   :  { %3366 = vst [vmem:[#allocation24_spill] sm:$0xff] %v2634_v41  ;;  %3367 = vst [vmem:[#allocation25_spill] sm:$0xff] %v2636_v9 }
  0xf5   :  { %1001 = vrot.lane.b32.xlu1 %v993_v59, %s2272_s18  ;;  %1029 = vrot.lane.b32.xlu0 %v1022_v44, %s2272_s18  ;;  %v90_v44 = vstv %s89_s11  ;;  %s2136_s11 = sld [smem:[#allocation7 + $0x4]] }
  0xf6   :  { %v92_v15 = vmul.f32 %v90_v44, %v2321_v4  ;;  %v94_v54 = vmul.f32 %v90_v44, %v2329_v10 }
  0xf7   :  { %v2641_v43 = vpop.permute.xlu1 %456  ;;  %v2643_v42 = vpop.permute.xlu0 %484 }
  0xf8   :  { %3368 = vst [vmem:[#allocation26_spill] sm:$0xff] %v2641_v43  ;;  %3369 = vst [vmem:[#allocation27_spill] sm:$0xff] %v2643_v42 }
  0xf9   :  { %1033 = vrot.lane.b32.xlu1 %v1025_v35, %s2272_s18  ;;  %1031 = vrot.lane.b32.xlu0 %v1026_v18, %s2272_s18  ;;  %v88_v35 = vstv %s3349_s2  ;;  %v100_v18 = vstv %s2098_s0  ;;  %s2109_s2 = sld [smem:[#allocation6 + $0x3]] }
  0xfa   :  { %v102_v43 = vmul.f32 %v100_v18, %v2331_v11  ;;  %v101_v42 = vmul.f32 %v100_v18, %v2319_v3  ;;  %s2137_s0 = sld [smem:[#allocation7 + $0x5]] }
  0xfb   :  { %v2647_v58 = vpop.permute.xlu1 %514  ;;  %v2649_v49 = vpop.permute.xlu0 %486 }
  0xfc   :  { %3370 = vst [vmem:[#allocation28_spill] sm:$0xff] %v2647_v58  ;;  %3371 = vst [vmem:[#allocation29_spill] sm:$0xff] %v2649_v49  ;;  %v93_v49 = vmul.f32 %v90_v44, %v2315_v0  ;;  %v96_v58 = vadd.f32 %v92_v15, %v88_v35 }
  0xfe   :  { %v97_v41 = vadd.f32 %v93_v49, %v88_v35  ;;  %v106_v32 = vadd.f32 %v102_v43, %v96_v58  ;;  %v104_v43 = vmul.f32 %v100_v18, %v2345_v19 }
  0xff   :  { %v2651_v8 = vpop.permute.xlu1 %488  ;;  %v2653_v59 = vpop.permute.xlu0 %516 }
 0x100   :  { %3372 = vst [vmem:[#allocation30_spill] sm:$0xff] %v2651_v8  ;;  %3373 = vst [vmem:[#allocation31_spill] sm:$0xff] %v2653_v59  ;;  %v91_v8 = vmul.f32 %v90_v44, %v2317_v1 }
 0x102   :  { %v95_v34 = vadd.f32 %v91_v8, %v88_v35  ;;  %v98_v8 = vadd.f32 %v94_v54, %v88_v35 }
 0x103   :  { %v2656_v31 = vpop.permute.xlu1 %546  ;;  %v2658_v17 = vpop.permute.xlu0 %518 }
 0x104   :  { %3374 = vst [vmem:[#allocation32_spill] sm:$0xff] %v2656_v31  ;;  %3375 = vst [vmem:[#allocation33_spill] sm:$0xff] %v2658_v17  ;;  %v103_v31 = vmul.f32 %v100_v18, %v2339_v16  ;;  %v110_v17 = vstv %s2099_s1  ;;  %v105_v30 = vadd.f32 %v101_v42, %v95_v34  ;;  %s2139_s1 = sld [smem:[#allocation7 + $0x7]] }
 0x105   :  { %v112_v60 = vmul.f32 %v110_v17, %v2347_v20  ;;  %v111_v2 = vmul.f32 %v110_v17, %v2337_v14  ;;  %v121_v20 = vmul.f32 %v120_v24, %v2353_v23  ;;  %v114_v34 = vmul.f32 %v110_v17, %v2361_v28 }
 0x107   :  { %v2666_v59 = vpop.permute.xlu1 %520  ;;  %v2668_v9 = vpop.permute.xlu0 %548  ;;  %v116_v49 = vadd.f32 %v112_v60, %v106_v32 }
 0x108   :  { %3376 = vst [vmem:[#allocation34_spill] sm:$0xff] %v2666_v59  ;;  %3377 = vst [vmem:[#allocation35_spill] sm:$0xff] %v2668_v9  ;;  %v113_v59 = vmul.f32 %v110_v17, %v2355_v25  ;;  %v107_v9 = vadd.f32 %v103_v31, %v97_v41  ;;  %v115_v25 = vadd.f32 %v111_v2, %v105_v30 }
 0x109   :  { %v126_v41 = vadd.f32 %v122_v50, %v116_v49  ;;  %v108_v31 = vadd.f32 %v104_v43, %v98_v8 }
 0x10a   :  { %v125_v42 = vadd.f32 %v121_v20, %v115_v25 }
 0x10b   :  { %v2674_v61 = vpop.permute.xlu1 %578  ;;  %v2676_v15 = vpop.permute.xlu0 %550  ;;  %v152_v35 = vadd.f32 %v2494_v53, %v126_v41  ;;  %v118_v18 = vadd.f32 %v114_v34, %v108_v31 }
 0x10c   :  { %3378 = vst [vmem:[#allocation36_spill] sm:$0xff] %v2674_v61  ;;  %3379 = vst [vmem:[#allocation37_spill] sm:$0xff] %v2676_v15  ;;  %v123_v61 = vmul.f32 %v120_v24, %v2369_v33  ;;  %v117_v15 = vadd.f32 %v113_v59, %v107_v9  ;;  %v124_v9 = vmul.f32 %v120_v24, %v2375_v36 }
 0x10d   :  { %v178_v50 = vadd.f32 %v2505_v63, %v152_v35  ;;  %v151_v17 = vadd.f32 %v2486_v47, %v125_v42 }
 0x10e   :  { %v127_v32 = vadd.f32 %v123_v61, %v117_v15  ;;  %v128_v49 = vadd.f32 %v124_v9, %v118_v18  ;;  %v338_v61 = vstv %s2109_s2  ;;  %v363_v15 = vstv %s2110_s15  ;;  %s2149_s2 = sld [smem:[#allocation7 + $0x10]] }
 0x10f   :  { %v2682_v58 = vpop.permute.xlu1 %552  ;;  %v2684_v44 = vpop.permute.xlu0 %580  ;;  %v204_v8 = vadd.f32 %v2524_v27, %v178_v50  ;;  %v177_v53 = vadd.f32 %v2492_v52, %v151_v17  ;;  %v339_v41 = vmul.f32 %v338_v61, %v2317_v1  ;;  %v340_v31 = vmul.f32 %v338_v61, %v2321_v4  ;;  %s2150_s15 = sld [smem:[#allocation7 + $0x11]] }
 0x110   :  { %v153_v30 = vadd.f32 %v2484_v46, %v127_v32  ;;  %v154_v46 = vadd.f32 %v2503_v62, %v128_v49  ;;  %v364_v34 = vmul.f32 %v363_v15, %v2319_v3  ;;  %v365_v1 = vmul.f32 %v363_v15, %v2331_v11  ;;  %v3381_v49 = vld [vmem:[#allocation18_spill] sm:$0xff] }
 0x111   :  { %v230_v63 = vadd.f32 %v2542_v48, %v204_v8  ;;  %v203_v47 = vadd.f32 %v2510_v12, %v177_v53  ;;  %v342_v4 = vmul.f32 %v338_v61, %v2329_v10  ;;  %v2732_v3 = vmul.f32 %v363_v15, %v2345_v19 }
 0x112   :  { %v179_v24 = vadd.f32 %v2512_v13, %v153_v30  ;;  %v180_v62 = vadd.f32 %v2522_v26, %v154_v46  ;;  %v349_v35 = vrot.slane %v340_v31, 1  ;;  %v387_v11 = vstv %s2703_s16  ;;  %v3380_v30 = vld [vmem:[#allocation15_spill] sm:$0xff]  ;;  %s1099_s16 = sld [smem:[#allocation7]] }
 0x113   :  { %v2689_v60 = vpop.permute.xlu1 %610  ;;  %v2691_v54 = vpop.permute.xlu0 %582  ;;  %v256_v43 = vadd.f32 %v2560_v7, %v230_v63  ;;  %v229_v12 = vadd.f32 %v2528_v37, %v203_v47  ;;  %v341_v7 = vmul.f32 %v338_v61, %v2315_v0  ;;  %v352_v9 = vrot.slane %v342_v4, 1  ;;  %v3384_v47 = vld [vmem:[#allocation17_spill] sm:$0xff] }
 0x114   :  { %v205_v27 = vadd.f32 %v2530_v38, %v179_v24  ;;  %v206_v32 = vadd.f32 %v2540_v45, %v180_v62  ;;  %v376_v61 = vrot.slane %v2732_v3, 1  ;;  %v3386_v62 = vld [vmem:[#allocation14_spill] sm:$0xff] }
 0x115   :  { %v282_v48 = vadd.f32 %v2578_v40, %v256_v43  ;;  %v255_v42 = vadd.f32 %v2546_v56, %v229_v12  ;;  %v366_v40 = vmul.f32 %v363_v15, %v2339_v16  ;;  %v351_v50 = vrot.slane %v341_v7, 1  ;;  %v3383_v15 = vld [vmem:[#allocation16_spill] sm:$0xff]  ;;  %v3385_v43 = vld [vmem:[#allocation21_spill] sm:$0xff] }
 0x116   :  { %v231_v38 = vadd.f32 %v2548_v57, %v205_v27  ;;  %v348_v57 = vrot.slane %v339_v41, 1  ;;  %v232_v0 = vadd.f32 %v2558_v6, %v206_v32  ;;  %v3382_v6 = vld [vmem:[#allocation13_spill] sm:$0xff]  ;;  %v390_v12 = vmul.f32 %v387_v11, %v3386_v62  ;;  %v3390_v62 = vld [vmem:[#allocation23_spill] sm:$0xff] }
 0x117   :  { %v2695_v59 = vpop.permute.xlu1 %584  ;;  %v2697_v2 = vpop.permute.xlu0 %612  ;;  %v308_v37 = vadd.f32 %v2596_v5, %v282_v48  ;;  %v281_v19 = vadd.f32 %v2564_v21, %v255_v42  ;;  %v373_v5 = vrot.slane %v365_v1, 1  ;;  %v375_v53 = vrot.slane %v366_v40, 1  ;;  %v3387_v48 = vld [vmem:[#allocation19_spill] sm:$0xff]  ;;  %v3388_v40 = vld [vmem:[#allocation20_spill] sm:$0xff] }
 0x118   :  { %v257_v26 = vadd.f32 %v2566_v22, %v231_v38  ;;  %v372_v22 = vrot.slane %v364_v34, 1  ;;  %v258_v16 = vadd.f32 %v2576_v39, %v232_v0  ;;  %v389_v24 = vmul.f32 %v387_v11, %v3382_v6 }
 0x119   :  { %v334_v56 = vadd.f32 %v2614_v55, %v308_v37  ;;  %v307_v17 = vadd.f32 %v3380_v30, %v281_v19  ;;  %v411_v21 = vstv %s2719_s17  ;;  %v350_v31 = vsel %vm347_vm0, %v348_v57, %v349_v35  ;;  %s1097_s17 = sld [smem:[#allocation9]] }
 0x11a   :  { %v283_v45 = vadd.f32 %v2584_v51, %v257_v26  ;;  %v388_v51 = vmul.f32 %v387_v11, %v2337_v14  ;;  %v284_v46 = vadd.f32 %v3383_v15, %v258_v16  ;;  %v353_v34 = vsel %vm347_vm0, %v351_v50, %v352_v9 }
 0x11b   :  { %v2705_v20 = vpop.permute.xlu1 %642  ;;  %v2707_v25 = vpop.permute.xlu0 %614  ;;  %v333_v39 = vadd.f32 %v3384_v47, %v307_v17  ;;  %v359_v27 = vadd.f32 %v349_v35, %v334_v56  ;;  %v391_v38 = vmul.f32 %v387_v11, %v2361_v28  ;;  %v374_v14 = vsel %vm347_vm0, %v372_v22, %v373_v5 }
 0x11c   :  { %v309_v8 = vadd.f32 %v3381_v49, %v283_v45  ;;  %v310_v1 = vadd.f32 %v3387_v48, %v284_v46  ;;  %v413_v4 = vmul.f32 %v411_v21, %v2363_v29  ;;  %v377_v3 = vsel %vm347_vm0, %v375_v53, %v376_v61 }
 0x11d   :  { %v397_v7 = vrot.slane %v389_v24, 1  ;;  %v396_v32 = vrot.slane %v388_v51, 1  ;;  %v412_v42 = vmul.f32 %v411_v21, %v2353_v23  ;;  %v358_v57 = vadd.f32 %v350_v31, %v333_v39 }
 0x11e   :  { %v335_v41 = vadd.f32 %v3385_v43, %v309_v8  ;;  %v383_v35 = vadd.f32 %v373_v5, %v359_v27  ;;  %v336_v28 = vadd.f32 %v3388_v40, %v310_v1  ;;  %v399_v0 = vrot.slane %v390_v12, 1  ;;  %v3389_v27 = vld [vmem:[#allocation22_spill] sm:$0xff]  ;;  %v2187_v40 = vld [vmem:[#allocation3] sm:$0xff] }
 0x11f   :  { %v2721_v52 = vpop.permute.xlu1 %616  ;;  %v2723_v13 = vpop.permute.xlu0 %644  ;;  %v400_v19 = vrot.slane %v391_v38, 1  ;;  %v414_v45 = vmul.f32 %v411_v21, %v2369_v33  ;;  %v415_v29 = vmul.f32 %v411_v21, %v2375_v36  ;;  %v421_v56 = vrot.slane %v413_v4, 1  ;;  %v3392_v4 = vld [vmem:[#allocation24_spill] sm:$0xff] }
 0x120   :  { %v360_v11 = vadd.f32 %v353_v34, %v335_v41  ;;  %v420_v22 = vrot.slane %v412_v42, 1  ;;  %v382_v16 = vadd.f32 %v374_v14, %v358_v57  ;;  %v361_v30 = vadd.f32 %v352_v9, %v336_v28  ;;  %v3394_v57 = vld [vmem:[#allocation31_spill] sm:$0xff] }
 0x121   :  { %v407_v49 = vadd.f32 %v397_v7, %v383_v35  ;;  %v398_v5 = vsel %vm347_vm0, %v396_v32, %v397_v7  ;;  %v401_v8 = vsel %vm347_vm0, %v399_v0, %v400_v19  ;;  %v423_v53 = vrot.slane %v414_v45, 1  ;;  %v3393_v7 = vld [vmem:[#allocation25_spill] sm:$0xff] }
 0x122   :  { %v384_v17 = vadd.f32 %v377_v3, %v360_v11  ;;  %v424_v6 = vrot.slane %v415_v29, 1  ;;  %v385_v24 = vadd.f32 %v376_v61, %v361_v30  ;;  %v406_v51 = vadd.f32 %v398_v5, %v382_v16  ;;  %v3391_v61 = vld [vmem:[#allocation27_spill] sm:$0xff]  ;;  %v2188_v11 = vld [vmem:[#allocation3 + $0x8] sm:$0xff]  ;;  %v3396_v29 = vld [vmem:[#allocation28_spill] sm:$0xff] }
 0x123   :  { %v2741_v18 = vpop.permute.xlu1 %674  ;;  %v2743_v10 = vpop.permute.xlu0 %646  ;;  %v431_v21 = vadd.f32 %v421_v56, %v407_v49  ;;  %v422_v46 = vsel %vm347_vm0, %v420_v22, %v421_v56  ;;  %v691_v14 = vstv %s2121_s19  ;;  %v3397_v22 = vld [vmem:[#allocation29_spill] sm:$0xff]  ;;  %v3398_v30 = vld [vmem:[#allocation35_spill] sm:$0xff]  ;;  %v716_v49 = vstv %s2122_s20  ;;  %s2156_s19 = sld [smem:[#allocation7 + $0x16]] }
 0x124   :  { %v408_v15 = vadd.f32 %v401_v8, %v384_v17  ;;  %v425_v9 = vsel %vm347_vm0, %v423_v53, %v424_v6  ;;  %v430_v41 = vadd.f32 %v422_v46, %v406_v51  ;;  %v409_v34 = vadd.f32 %v400_v19, %v385_v24  ;;  %v3395_v19 = vld [vmem:[#allocation26_spill] sm:$0xff]  ;;  %v3400_v24 = vld [vmem:[#allocation32_spill] sm:$0xff]  ;;  %v3401_v51 = vld [vmem:[#allocation33_spill] sm:$0xff]  ;;  %s3039_s20 = sld [smem:[#allocation7 + $0x1f]] }
 0x125   :  { %v463_v43 = vadd.f32 %v3389_v27, %v431_v21  ;;  %v692_v28 = vmul.f32 %v2187_v40, %v691_v14  ;;  %v693_v0 = vmul.f32 %v2188_v11, %v691_v14  ;;  %v3399_v53 = vld [vmem:[#allocation30_spill] sm:$0xff] }
 0x126   :  { %v432_v31 = vadd.f32 %v425_v9, %v408_v15  ;;  %v462_v12 = vadd.f32 %v3390_v62, %v430_v41  ;;  %v433_v42 = vadd.f32 %v424_v6, %v409_v34  ;;  %v3404_v62 = vld [vmem:[#allocation37_spill] sm:$0xff] }
 0x127   :  { %v2756_v63 = vpop.permute.xlu1 %648  ;;  %v2758_v55 = vpop.permute.xlu0 %676  ;;  %v495_v38 = vadd.f32 %v3391_v61, %v463_v43  ;;  %v701_v9 = vrot.slane %v692_v28, 2  ;;  %v702_v27 = vrot.slane %v693_v0, 2  ;;  %v3402_v43 = vld [vmem:[#allocation34_spill] sm:$0xff] }
 0x128   :  { %v494_v3 = vadd.f32 %v3392_v4, %v462_v12  ;;  %v464_v32 = vadd.f32 %v3393_v7, %v432_v31  ;;  %v465_v45 = vadd.f32 %v3395_v19, %v433_v42  ;;  %v3403_v31 = vld [vmem:[#allocation36_spill] sm:$0xff] }
 0x129   :  { %v527_v35 = vadd.f32 %v3394_v57, %v495_v38  ;;  %v2189_v38 = vld [vmem:[#allocation3 + $0x10] sm:$0xff]  ;;  %v2193_v19 = vld [vmem:[#allocation3 + $0x58] sm:$0xff] }
 0x12a   :  { %v526_v56 = vadd.f32 %v3396_v29, %v494_v3  ;;  %v496_v16 = vadd.f32 %v3397_v22, %v464_v32  ;;  %v497_v6 = vadd.f32 %v3399_v53, %v465_v45  ;;  %v717_v4 = vmul.f32 %v2189_v38, %v716_v49  ;;  %v2190_v3 = vld [vmem:[#allocation3 + $0x18] sm:$0xff]  ;;  %v2191_v32 = vld [vmem:[#allocation3 + $0x48] sm:$0xff]  ;;  %v2194_v29 = vld [vmem:[#allocation3 + $0x50] sm:$0xff] }
 0x12b   :  { %v2772_v26 = vpop.permute.xlu1 %680  ;;  %v2774_v37 = vpop.permute.xlu0 %678  ;;  %v559_v17 = vadd.f32 %v3398_v30, %v527_v35  ;;  %v718_v7 = vmul.f32 %v2190_v3, %v716_v49  ;;  %v2825_v42 = vmul.f32 %v2191_v32, %v691_v14  ;;  %v2835_v45 = vmul.f32 %v2193_v19, %v716_v49 }
 0x12c   :  { %v558_v21 = vadd.f32 %v3400_v24, %v526_v56  ;;  %v528_v15 = vadd.f32 %v3401_v51, %v496_v16  ;;  %v529_v41 = vadd.f32 %v3402_v43, %v497_v6  ;;  %v719_v56 = vmul.f32 %v2194_v29, %v716_v49 }
 0x12d   :  { %v591_v46 = vadd.f32 %v2684_v44, %v559_v17  ;;  %v2192_v44 = vld [vmem:[#allocation3 + $0x40] sm:$0xff]  ;;  %v740_v22 = vstv %s2805_s21  ;;  %v764_v51 = vstv %s2819_s22  ;;  %s2142_s21 = sld [smem:[#allocation7 + $0x9]] }
 0x12e   :  { %v590_v34 = vadd.f32 %v3403_v31, %v558_v21  ;;  %v560_v12 = vadd.f32 %v3404_v62, %v528_v15  ;;  %v694_v57 = vmul.f32 %v2192_v44, %v691_v14  ;;  %v561_v28 = vadd.f32 %v2682_v58, %v529_v41  ;;  %v2196_v15 = vld [vmem:[#allocation3 + $0x20] sm:$0xff]  ;;  %s2141_s22 = sld [smem:[#allocation9 + $0x1]] }
 0x12f   :  { %v2779_v50 = vpop.permute.xlu1 %805  ;;  %v2781_v23 = vpop.permute.xlu0 %803  ;;  %v623_v61 = vadd.f32 %v2697_v2, %v591_v46  ;;  %v741_v46 = vmul.f32 %v2196_v15, %v740_v22  ;;  %v728_v41 = vrot.slane %v719_v56, 2 }
 0x130   :  { %v622_v11 = vadd.f32 %v2689_v60, %v590_v34  ;;  %v592_v2 = vadd.f32 %v2691_v54, %v560_v12  ;;  %v593_v14 = vadd.f32 %v2695_v59, %v561_v28  ;;  %v703_v60 = vsel %vm700_vm1, %v701_v9, %v702_v27  ;;  %v2197_v34 = vld [vmem:[#allocation3 + $0x60] sm:$0xff] }
 0x131   :  { %v655_v0 = vadd.f32 %v2723_v13, %v623_v61  ;;  %v725_v54 = vrot.slane %v717_v4, 2  ;;  %v705_v13 = vrot.slane %v2825_v42, 2  ;;  %v704_v17 = vrot.slane %v694_v57, 2 }
 0x132   :  { %v654_v16 = vadd.f32 %v2705_v20, %v622_v11  ;;  %v624_v30 = vadd.f32 %v2707_v25, %v592_v2  ;;  %v625_v49 = vadd.f32 %v2721_v52, %v593_v14  ;;  %v726_v59 = vrot.slane %v718_v7, 2 }
 0x133   :  { %v2785_v33 = vpop.permute.xlu1 %835  ;;  %v2787_v36 = vpop.permute.xlu0 %807  ;;  %v687_v58 = vadd.f32 %v2758_v55, %v655_v0  ;;  %v729_v25 = vrot.slane %v2835_v45, 2  ;;  %v2195_v55 = vld [vmem:[#allocation3 + $0x28] sm:$0xff]  ;;  %v706_v52 = vsel %vm700_vm1, %v704_v17, %v705_v13  ;;  %v743_v62 = vmul.f32 %v2197_v34, %v740_v22  ;;  %v2201_v0 = vld [vmem:[#allocation3 + $0x70] sm:$0xff]  ;;  %v2202_v45 = vld [vmem:[#allocation3 + $0x78] sm:$0xff] }
 0x134   :  { %v686_v20 = vadd.f32 %v2741_v18, %v654_v16  ;;  %v656_v24 = vadd.f32 %v2743_v10, %v624_v30  ;;  %v742_v21 = vmul.f32 %v2195_v55, %v740_v22  ;;  %v657_v9 = vadd.f32 %v2756_v63, %v625_v49  ;;  %v2198_v18 = vld [vmem:[#allocation3 + $0x68] sm:$0xff] }
 0x135   :  { %v712_v43 = vadd.f32 %v702_v27, %v687_v58  ;;  %v744_v12 = vmul.f32 %v2198_v18, %v740_v22  ;;  %v727_v38 = vsel %vm700_vm1, %v725_v54, %v726_v59  ;;  %v2199_v27 = vld [vmem:[#allocation3 + $0x38] sm:$0xff]  ;;  %v749_v32 = vrot.slane %v741_v46, 2 }
 0x136   :  { %v688_v31 = vadd.f32 %v2774_v37, %v656_v24  ;;  %v711_v4 = vadd.f32 %v703_v60, %v686_v20  ;;  %v689_v3 = vadd.f32 %v2772_v26, %v657_v9  ;;  %v750_v63 = vrot.slane %v742_v21, 2  ;;  %v2200_v37 = vld [vmem:[#allocation3 + $0x30] sm:$0xff] }
 0x137   :  { %v2791_v47 = vpop.permute.xlu1 %809  ;;  %v2793_v39 = vpop.permute.xlu0 %837  ;;  %v766_v7 = vmul.f32 %v2199_v27, %v764_v51  ;;  %v765_v42 = vmul.f32 %v2200_v37, %v764_v51  ;;  %v736_v44 = vadd.f32 %v726_v59, %v712_v43  ;;  %v730_v57 = vsel %vm700_vm1, %v728_v41, %v729_v25 }
 0x138   :  { %v713_v28 = vadd.f32 %v706_v52, %v688_v31  ;;  %v752_v11 = vrot.slane %v743_v62, 2  ;;  %v753_v2 = vrot.slane %v744_v12, 2  ;;  %v767_v19 = vmul.f32 %v2201_v0, %v764_v51 }
 0x139   :  { %v768_v29 = vmul.f32 %v2202_v45, %v764_v51  ;;  %v735_v14 = vadd.f32 %v727_v38, %v711_v4  ;;  %v714_v26 = vadd.f32 %v705_v13, %v689_v3  ;;  %v774_v16 = vrot.slane %v766_v7, 2 }
 0x13a   :  { %v751_v30 = vsel %vm700_vm1, %v749_v32, %v750_v63  ;;  %v773_v58 = vrot.slane %v765_v42, 2  ;;  %v737_v60 = vadd.f32 %v730_v57, %v713_v28  ;;  %v760_v54 = vadd.f32 %v750_v63, %v736_v44 }
 0x13b   :  { %v2798_v48 = vpop.permute.xlu1 %867  ;;  %v2800_v1 = vpop.permute.xlu0 %839  ;;  %v754_v17 = vsel %vm700_vm1, %v752_v11, %v753_v2  ;;  %v776_v49 = vrot.slane %v767_v19, 2  ;;  %v777_v59 = vrot.slane %v768_v29, 2  ;;  %v738_v55 = vadd.f32 %v729_v25, %v714_v26 }
 0x13c   :  { %v759_v21 = vadd.f32 %v751_v30, %v735_v14  ;;  %v775_v51 = vsel %vm700_vm1, %v773_v58, %v774_v16  ;;  %v784_v15 = vadd.f32 %v774_v16, %v760_v54  ;;  %v761_v46 = vadd.f32 %v754_v17, %v737_v60 }
 0x13d   :  { %v778_v13 = vsel %vm700_vm1, %v776_v49, %v777_v59  ;;  %v762_v31 = vadd.f32 %v753_v2, %v738_v55 }
 0x13e   :  { %v783_v41 = vadd.f32 %v775_v51, %v759_v21  ;;  %v816_v52 = vadd.f32 %v2779_v50, %v784_v15  ;;  %v785_v62 = vadd.f32 %v778_v13, %v761_v46 }
 0x13f   :  { %v2811_v5 = vpop.permute.xlu1 %841  ;;  %v2813_v8 = vpop.permute.xlu0 %869  ;;  %v786_v38 = vadd.f32 %v777_v59, %v762_v31 }
 0x140   :  { %v815_v34 = vadd.f32 %v2781_v23, %v783_v41  ;;  %v848_v4 = vadd.f32 %v2793_v39, %v816_v52  ;;  %v817_v3 = vadd.f32 %v2787_v36, %v785_v62 }
 0x141   :  { %v818_v63 = vadd.f32 %v2791_v47, %v786_v38 }
 0x142   :  { %v847_v25 = vadd.f32 %v2785_v33, %v815_v34  ;;  %v880_v7 = vadd.f32 %v2813_v8, %v848_v4  ;;  %v849_v23 = vadd.f32 %v2800_v1, %v817_v3 }
 0x143   :  { %v2827_v35 = vpop.permute.xlu1 %899  ;;  %v2829_v40 = vpop.permute.xlu0 %871  ;;  %v850_v37 = vadd.f32 %v2811_v5, %v818_v63 }
 0x144   :  { %v879_v27 = vadd.f32 %v2798_v48, %v847_v25  ;;  %v881_v39 = vadd.f32 %v2829_v40, %v849_v23 }
 0x146   :  { %v911_v42 = vadd.f32 %v2827_v35, %v879_v27 }
 0x147   :  { %v2844_v53 = vpop.permute.xlu1 %873  ;;  %v2846_v6 = vpop.permute.xlu0 %901 }
 0x148   :  { %v912_v33 = vadd.f32 %v2846_v6, %v880_v7  ;;  %v882_v36 = vadd.f32 %v2844_v53, %v850_v37 }
 0x14b   :  { %v2856_v10 = vpop.permute.xlu1 %931  ;;  %v2858_v61 = vpop.permute.xlu0 %903 }
 0x14c   :  { %v943_v47 = vadd.f32 %v2856_v10, %v911_v42  ;;  %v913_v8 = vadd.f32 %v2858_v61, %v881_v39 }
 0x14f   :  { %v906_v56 = vpop.permute.xlu1 %905  ;;  %v934_v22 = vpop.permute.xlu0 %933 }
 0x150   :  { %v944_v44 = vadd.f32 %v934_v22, %v912_v33  ;;  %v914_v28 = vadd.f32 %v906_v56, %v882_v36 }
 0x153   :  { %v964_v20 = vpop.permute.xlu1 %963  ;;  %v936_v24 = vpop.permute.xlu0 %935 }
 0x154   :  { %v975_v11 = vadd.f32 %v964_v20, %v943_v47  ;;  %v945_v2 = vadd.f32 %v936_v24, %v913_v8  ;;  %v1110_v47 = vstv %s2133_s27  ;;  %s3109_s27 = sld [smem:[#allocation7 + $0x22]] }
 0x157   :  { %v938_v9 = vpop.permute.xlu1 %937  ;;  %v966_v43 = vpop.permute.xlu0 %965 }
 0x158   :  { %v976_v1 = vadd.f32 %v966_v43, %v944_v44  ;;  %v946_v5 = vadd.f32 %v938_v9, %v914_v28 }
 0x15b   :  { %v996_v18 = vpop.permute.xlu1 %995  ;;  %v968_v12 = vpop.permute.xlu0 %967 }
 0x15c   :  { %v1007_v0 = vadd.f32 %v996_v18, %v975_v11  ;;  %v977_v40 = vadd.f32 %v968_v12, %v945_v2 }
 0x15f   :  { %v970_v32 = vpop.permute.xlu1 %969  ;;  %v998_v50 = vpop.permute.xlu0 %997 }
 0x160   :  { %v1008_v35 = vadd.f32 %v998_v50, %v976_v1  ;;  %v978_v45 = vadd.f32 %v970_v32, %v946_v5  ;;  %v1136_v5 = vstv %s2134_s29  ;;  %s2161_s29 = sld [smem:[#allocation9 + $0x3]] }
 0x163   :  { %v1028_v48 = vpop.permute.xlu1 %1027  ;;  %v1000_v57 = vpop.permute.xlu0 %999 }
 0x164   :  { %v1039_v53 = vadd.f32 %v1028_v48, %v1007_v0  ;;  %v1009_v10 = vadd.f32 %v1000_v57, %v977_v40  ;;  %v1354_v40 = vstv %s2143_s30  ;;  %s2160_s30 = sld [smem:[#allocation7 + $0x1a]] }
 0x166   :  { %v1044_v26 = vsel %vm1043_vm3, %v1039_v53, 0.0 }
 0x167   :  { %v1002_v19 = vpop.permute.xlu1 %1001  ;;  %v1030_v6 = vpop.permute.xlu0 %1029 }
 0x168   :  { %v1040_v29 = vadd.f32 %v1030_v6, %v1008_v35  ;;  %v1010_v22 = vadd.f32 %v1002_v19, %v978_v45 }
 0x16a   :  { %v1046_v14 = vsel %vm1045_vm2, %v1040_v29, 0.0 }
 0x16b   :  { %v1034_v61 = vpop.permute.xlu1 %1033  ;;  %v1032_v56 = vpop.permute.xlu0 %1031  ;;  %v1047_v58 = vadd.f32 %v1046_v14, %v1044_v26 }
 0x16c   :  { %v1042_v16 = vadd.f32 %v1034_v61, %v1010_v22  ;;  %v1041_v30 = vadd.f32 %v1032_v56, %v1009_v10  ;;  %v1380_v22 = vstv %s2144_s6  ;;  %s3144_s6 = sld [smem:[#allocation7 + $0x23]] }
 0x16e   :  { %v1048_v60 = vsel %vm1043_vm3, %v1041_v30, 0.0  ;;  %v1050_v17 = vsel %vm1045_vm2, %v1042_v16, 0.0 }
 0x16f   :  { %v1049_v54 = vadd.f32 %v1048_v60, %v1047_v58 }
 0x171   :  { %v1051_v49 = vadd.f32 %v1050_v17, %v1049_v54  ;;  %v1624_v17 = vstv %s2154_s8 }
 0x173   :  { %1052 = vadd.xlane.f32.xlu0 %v1051_v49 }
 0x1fc   :  { %v1053_v59 = vpop.xlane.xlu0 %1052 }
 0x1fd   :  { %v1054_v20 = vrot.slane %v1053_v59, 4 }
 0x1ff   :  { %v1055_v24 = vadd.f32 %v1054_v20, %v1053_v59 }
 0x201   :  { %v1056_v55 = vrot.slane %v1055_v24, 2 }
 0x203   :  { %v1057_v21 = vadd.f32 %v1056_v55, %v1055_v24  ;;  %v1842_v55 = vstv %s2163_s9 }
 0x205   :  { %v1058_v51 = vrot.slane %v1057_v21, 1 }
 0x207   :  { %v1059_v15 = vadd.f32 %v1058_v51, %v1057_v21 }
 0x209   :  { %2171 = vpush %v1059_v15 }
 0x23a   :  { %s2172_s23 = spop %2171 }
 0x23b   :  { %s1061_s24 = smul.f32 0.0025510204, %s2172_s23  ;;  %s2157_s23 = sld [smem:[#allocation7 + $0x17]] }
 0x23d   :  { %v1062_v46 = vstv %s1061_s24  ;;  %s3074_s24 = sld [smem:[#allocation7 + $0x20]] }
 0x23e   :  { %v1063_v13 = vsub.f32 %v1039_v53, %v1062_v46  ;;  %v1064_v9 = vsub.f32 %v1040_v29, %v1062_v46  ;;  %v1065_v43 = vsub.f32 %v1041_v30, %v1062_v46  ;;  %v1066_v41 = vsub.f32 %v1042_v16, %v1062_v46 }
 0x23f   :  { %v1598_v16 = vstv %s2153_s7  ;;  %s2135_s7 = sld [smem:[#allocation7 + $0x3]] }
 0x240   :  { %v1067_v31 = vmul.f32 %v1063_v13, %v1063_v13  ;;  %v1068_v52 = vmul.f32 %v1064_v9, %v1064_v9  ;;  %v1069_v34 = vmul.f32 %v1065_v43, %v1065_v43  ;;  %v1070_v62 = vmul.f32 %v1066_v41, %v1066_v41 }
 0x242   :  { %v1071_v18 = vsel %vm1043_vm3, %v1067_v31, 0.0  ;;  %v1072_v12 = vsel %vm1045_vm2, %v1068_v52, 0.0  ;;  %v1074_v38 = vsel %vm1043_vm3, %v1069_v34, 0.0  ;;  %v1076_v3 = vsel %vm1045_vm2, %v1070_v62, 0.0 }
 0x243   :  { %v1073_v25 = vadd.f32 %v1072_v12, %v1071_v18  ;;  %v1218_v18 = vstv %s2137_s0  ;;  %s2148_s0 = sld [smem:[#allocation7 + $0xf]] }
 0x245   :  { %v1075_v4 = vadd.f32 %v1074_v38, %v1073_v25 }
 0x247   :  { %v1077_v63 = vadd.f32 %v1076_v3, %v1075_v4 }
 0x249   :  { %1078 = vadd.xlane.f32.xlu1 %v1077_v63 }
 0x2d2   :  { %v1079_v27 = vpop.xlane.xlu1 %1078 }
 0x2d3   :  { %v1080_v7 = vrot.slane %v1079_v27, 4 }
 0x2d5   :  { %v1081_v32 = vadd.f32 %v1080_v7, %v1079_v27 }
 0x2d7   :  { %v1082_v50 = vrot.slane %v1081_v32, 2 }
 0x2d9   :  { %v1083_v23 = vadd.f32 %v1082_v50, %v1081_v32 }
 0x2db   :  { %v1084_v37 = vrot.slane %v1083_v23, 1 }
 0x2dd   :  { %v1085_v42 = vadd.f32 %v1084_v37, %v1083_v23 }
 0x2df   :  { %2173 = vpush %v1085_v42 }
 0x310   :  { %s2174_s25 = spop %2173 }
 0x311   :  { %s1087_s3 = smul.f32 0.0025510204, %s2174_s25  ;;  %s2152_s25 = sld [smem:[#allocation7 + $0x12]] }
 0x313   :  { %s1088_s26 = sadd.f32 1e-05, %s1087_s3 }
 0x314   :  { %s2151_s3 = sld [smem:[#allocation9 + $0x2]] }
 0x315   :  { %v1089_v33 = vstv %s1088_s26  ;;  %s2159_s26 = sld [smem:[#allocation7 + $0x19]] }
 0x316   :  { %2185 = vrsqrt.f32 %v1089_v33 }
 0x323   :  { %v2186_v39 = vpop.eup %2185 }
 0x324   :  { %2175 = vpush %v2186_v39  ;;  %v1274_v39 = vstv %s2139_s1 }
 0x355   :  { %s2176_s28 = spop %2175 }
 0x356   :  { %v1092_v36 = vstv %s2176_s28  ;;  %s2162_s28 = sld [smem:[#allocation7 + $0x1b]] }
 0x357   :  { %v2891_v44 = vmul.f32 %v1092_v36, %v1063_v13  ;;  %v2893_v48 = vmul.f32 %v1092_v36, %v1064_v9  ;;  %v2895_v57 = vmul.f32 %v1092_v36, %v1065_v43  ;;  %v2897_v8 = vmul.f32 %v1092_v36, %v1066_v41 }
 0x358   :  { %v1868_v13 = vstv %s2164_s10  ;;  %v1186_v9 = vstv %s2136_s11 }
 0x359   :  { %v1112_v28 = vmul.f32 %v1110_v47, %v2893_v48  ;;  %v1111_v11 = vmul.f32 %v1110_v47, %v2891_v44  ;;  %v1114_v1 = vmul.f32 %v1110_v47, %v2897_v8  ;;  %v1113_v2 = vmul.f32 %v1110_v47, %v2895_v57 }
 0x35a   :  { %v1138_v0 = vmul.f32 %v1136_v5, %v2893_v48  ;;  %v1137_v35 = vmul.f32 %v1136_v5, %v2891_v44  ;;  %v1140_v19 = vmul.f32 %v1136_v5, %v2897_v8  ;;  %v1139_v6 = vmul.f32 %v1136_v5, %v2895_v57 }
 0x35b   :  { %1121 = vrot.lane.b32.xlu1 %v1112_v28, %s2271_s14  ;;  %1119 = vrot.lane.b32.xlu0 %v1111_v11, %s2271_s14  ;;  %v1356_v45 = vmul.f32 %v1354_v40, %v2893_v48  ;;  %v1355_v53 = vmul.f32 %v1354_v40, %v2891_v44  ;;  %v1358_v29 = vmul.f32 %v1354_v40, %v2897_v8  ;;  %v1306_v5 = vstv %s2140_s4 }
 0x35c   :  { %v1357_v10 = vmul.f32 %v1354_v40, %v2895_v57  ;;  %v1382_v14 = vmul.f32 %v1380_v22, %v2893_v48  ;;  %v1381_v61 = vmul.f32 %v1380_v22, %v2891_v44  ;;  %v1384_v56 = vmul.f32 %v1380_v22, %v2897_v8 }
 0x35d   :  { %v1383_v26 = vmul.f32 %v1380_v22, %v2895_v57  ;;  %v1600_v30 = vmul.f32 %v1598_v16, %v2893_v48  ;;  %v1599_v58 = vmul.f32 %v1598_v16, %v2891_v44  ;;  %v1602_v60 = vmul.f32 %v1598_v16, %v2897_v8 }
 0x35e   :  { %v1601_v54 = vmul.f32 %v1598_v16, %v2895_v57  ;;  %v1626_v49 = vmul.f32 %v1624_v17, %v2893_v48  ;;  %v1625_v59 = vmul.f32 %v1624_v17, %v2891_v44  ;;  %v1628_v20 = vmul.f32 %v1624_v17, %v2897_v8 }
 0x35f   :  { %1125 = vrot.lane.b32.xlu1 %v1114_v1, %s2271_s14  ;;  %1123 = vrot.lane.b32.xlu0 %v1113_v2, %s2271_s14  ;;  %v1627_v24 = vmul.f32 %v1624_v17, %v2895_v57  ;;  %v1844_v21 = vmul.f32 %v1842_v55, %v2893_v48  ;;  %v1843_v51 = vmul.f32 %v1842_v55, %v2891_v44 }
 0x360   :  { %v1846_v15 = vmul.f32 %v1842_v55, %v2897_v8  ;;  %v1845_v46 = vmul.f32 %v1842_v55, %v2895_v57  ;;  %v1870_v43 = vmul.f32 %v1868_v13, %v2893_v48  ;;  %v1869_v41 = vmul.f32 %v1868_v13, %v2891_v44 }
 0x361   :  { %v1188_v31 = vmul.f32 %v1186_v9, %v2893_v48  ;;  %v1187_v52 = vmul.f32 %v1186_v9, %v2891_v44  ;;  %v1872_v34 = vmul.f32 %v1868_v13, %v2897_v8  ;;  %v1871_v62 = vmul.f32 %v1868_v13, %v2895_v57 }
 0x362   :  { %v1190_v38 = vmul.f32 %v1186_v9, %v2897_v8  ;;  %v1189_v4 = vmul.f32 %v1186_v9, %v2895_v57  ;;  %v1220_v3 = vmul.f32 %v1218_v18, %v2893_v48  ;;  %v1219_v32 = vmul.f32 %v1218_v18, %v2891_v44 }
 0x363   :  { %1147 = vrot.lane.b32.xlu1 %v1138_v0, %s2272_s18  ;;  %1145 = vrot.lane.b32.xlu0 %v1137_v35, %s2272_s18  ;;  %v1196_v12 = vrot.slane %v1188_v31, 1  ;;  %v1195_v25 = vrot.slane %v1187_v52, 1  ;;  %v1222_v50 = vmul.f32 %v1218_v18, %v2897_v8  ;;  %v1221_v33 = vmul.f32 %v1218_v18, %v2895_v57 }
 0x364   :  { %v1199_v27 = vrot.slane %v1190_v38, 1  ;;  %v1198_v7 = vrot.slane %v1189_v4, 1  ;;  %v1228_v37 = vrot.slane %v1220_v3, 1  ;;  %v1227_v42 = vrot.slane %v1219_v32, 1 }
 0x365   :  { %v1197_v63 = vsel %vm347_vm0, %v1195_v25, %v1196_v12  ;;  %v1231_v36 = vrot.slane %v1222_v50, 1  ;;  %v1230_v28 = vrot.slane %v1221_v33, 1  ;;  %v1276_v11 = vmul.f32 %v1274_v39, %v2893_v48 }
 0x366   :  { %v1200_v23 = vsel %vm347_vm0, %v1198_v7, %v1199_v27  ;;  %v1229_v47 = vsel %vm347_vm0, %v1227_v42, %v1228_v37  ;;  %v1275_v1 = vmul.f32 %v1274_v39, %v2891_v44  ;;  %v1278_v2 = vmul.f32 %v1274_v39, %v2897_v8 }
 0x367   :  { %1151 = vrot.lane.b32.xlu1 %v1140_v19, %s2272_s18  ;;  %1149 = vrot.lane.b32.xlu0 %v1139_v6, %s2272_s18  ;;  %v1232_v0 = vsel %vm347_vm0, %v1230_v28, %v1231_v36  ;;  %v1284_v35 = vrot.slane %v1276_v11, 2  ;;  %v1277_v6 = vmul.f32 %v1274_v39, %v2895_v57  ;;  %v1308_v40 = vmul.f32 %v1306_v5, %v2893_v48 }
 0x368   :  { %v1283_v19 = vrot.slane %v1275_v1, 2  ;;  %v1310_v22 = vmul.f32 %v1306_v5, %v2897_v8  ;;  %v1309_v16 = vmul.f32 %v1306_v5, %v2895_v57  ;;  %v1550_v50 = vstv %s2150_s15 }
 0x369   :  { %v1552_v39 = vmul.f32 %v1550_v50, %v2893_v48 }
 0x36b   :  { %1365 = vrot.lane.b32.xlu1 %v1356_v45, %s2271_s14  ;;  %1363 = vrot.lane.b32.xlu0 %v1355_v53, %s2271_s14  ;;  %v1285_v45 = vsel %vm700_vm1, %v1283_v19, %v1284_v35  ;;  %v1287_v53 = vrot.slane %v1278_v2, 2  ;;  %v1560_v19 = vrot.slane %v1552_v39, 2 }
 0x36f   :  { %1369 = vrot.lane.b32.xlu1 %v1358_v29, %s2271_s14  ;;  %1367 = vrot.lane.b32.xlu0 %v1357_v10, %s2271_s14  ;;  %v1286_v29 = vrot.slane %v1277_v6, 2  ;;  %v1307_v10 = vmul.f32 %v1306_v5, %v2891_v44  ;;  %v1554_v5 = vmul.f32 %v1550_v50, %v2897_v8 }
 0x373   :  { %1391 = vrot.lane.b32.xlu1 %v1382_v14, %s2272_s18  ;;  %1389 = vrot.lane.b32.xlu0 %v1381_v61, %s2272_s18  ;;  %v1430_v14 = vstv %s2146_s12  ;;  %v1288_v61 = vsel %vm700_vm1, %v1286_v29, %v1287_v53 }
 0x374   :  { %v1431_v17 = vmul.f32 %v1430_v14, %v2891_v44  ;;  %v1434_v55 = vmul.f32 %v1430_v14, %v2897_v8 }
 0x377   :  { %1395 = vrot.lane.b32.xlu1 %v1384_v56, %s2272_s18  ;;  %1393 = vrot.lane.b32.xlu0 %v1383_v26, %s2272_s18  ;;  %v1316_v56 = vrot.slane %v1308_v40, 2  ;;  %v1315_v26 = vrot.slane %v1307_v10, 2  ;;  %v1553_v40 = vmul.f32 %v1550_v50, %v2895_v57 }
 0x37b   :  { %1609 = vrot.lane.b32.xlu1 %v1600_v30, %s2271_s14  ;;  %1607 = vrot.lane.b32.xlu0 %v1599_v58, %s2271_s14  ;;  %v1432_v30 = vmul.f32 %v1430_v14, %v2893_v48  ;;  %v1317_v58 = vsel %vm700_vm1, %v1315_v26, %v1316_v56 }
 0x37f   :  { %1613 = vrot.lane.b32.xlu1 %v1602_v60, %s2271_s14  ;;  %1611 = vrot.lane.b32.xlu0 %v1601_v54, %s2271_s14  ;;  %v1319_v60 = vrot.slane %v1310_v22, 2  ;;  %v1318_v54 = vrot.slane %v1309_v16, 2  ;;  %v1563_v16 = vrot.slane %v1554_v5, 2 }
 0x383   :  { %1635 = vrot.lane.b32.xlu1 %v1626_v49, %s2272_s18  ;;  %1633 = vrot.lane.b32.xlu0 %v1625_v59, %s2272_s18  ;;  %v1440_v49 = vrot.slane %v1432_v30, 1  ;;  %v1462_v59 = vstv %s2147_s13  ;;  %v1562_v30 = vrot.slane %v1553_v40, 2 }
 0x384   :  { %v1463_v9 = vmul.f32 %v1462_v59, %v2891_v44 }
 0x387   :  { %1639 = vrot.lane.b32.xlu1 %v1628_v20, %s2272_s18  ;;  %1637 = vrot.lane.b32.xlu0 %v1627_v24, %s2272_s18  ;;  %v1320_v20 = vsel %vm700_vm1, %v1318_v54, %v1319_v60  ;;  %v1439_v24 = vrot.slane %v1431_v17, 1 }
 0x38b   :  { %1853 = vrot.lane.b32.xlu1 %v1844_v21, %s2271_s14  ;;  %1851 = vrot.lane.b32.xlu0 %v1843_v51, %s2271_s14  ;;  %v1433_v21 = vmul.f32 %v1430_v14, %v2895_v57  ;;  %v1464_v51 = vmul.f32 %v1462_v59, %v2893_v48 }
 0x38d   :  { %v1442_v13 = vrot.slane %v1433_v21, 1  ;;  %v1472_v52 = vrot.slane %v1464_v51, 1 }
 0x38f   :  { %1857 = vrot.lane.b32.xlu1 %v1846_v15, %s2271_s14  ;;  %1855 = vrot.lane.b32.xlu0 %v1845_v46, %s2271_s14  ;;  %v1441_v15 = vsel %vm347_vm0, %v1439_v24, %v1440_v49  ;;  %v1443_v46 = vrot.slane %v1434_v55, 1 }
 0x391   :  { %v1444_v31 = vsel %vm347_vm0, %v1442_v13, %v1443_v46  ;;  %v1918_v13 = vstv %s3039_s20 }
 0x392   :  { %v1921_v39 = vmul.f32 %v1918_v13, %v2895_v57 }
 0x393   :  { %1879 = vrot.lane.b32.xlu1 %v1870_v43, %s2272_s18  ;;  %1877 = vrot.lane.b32.xlu0 %v1869_v41, %s2272_s18  ;;  %v1466_v43 = vmul.f32 %v1462_v59, %v2897_v8  ;;  %v1518_v41 = vstv %s2149_s2 }
 0x394   :  { %v1520_v18 = vmul.f32 %v1518_v41, %v2893_v48  ;;  %v1522_v7 = vmul.f32 %v1518_v41, %v2897_v8  ;;  %v1521_v32 = vmul.f32 %v1518_v41, %v2895_v57 }
 0x395   :  { %v1475_v38 = vrot.slane %v1466_v43, 1 }
 0x396   :  { %v1528_v3 = vrot.slane %v1520_v18, 2  ;;  %v1531_v42 = vrot.slane %v1522_v7, 2  ;;  %v1530_v33 = vrot.slane %v1521_v32, 2 }
 0x397   :  { %1883 = vrot.lane.b32.xlu1 %v1872_v34, %s2272_s18  ;;  %1881 = vrot.lane.b32.xlu0 %v1871_v62, %s2272_s18  ;;  %v1471_v34 = vrot.slane %v1463_v9, 1  ;;  %v1465_v62 = vmul.f32 %v1462_v59, %v2895_v57 }
 0x399   :  { %v1473_v25 = vsel %vm347_vm0, %v1471_v34, %v1472_v52  ;;  %v1474_v4 = vrot.slane %v1465_v62, 1  ;;  %v1344_v34 = vstv %s2142_s21 }
 0x39a   :  { %v1345_v7 = vmul.f32 %v1344_v34, %v2891_v44 }
 0x39b   :  { %1203 = vrot.lane.b32.xlu1 %v1196_v12, %s2271_s14  ;;  %1201 = vrot.lane.b32.xlu0 %v1197_v63, %s2271_s14  ;;  %v1519_v12 = vmul.f32 %v1518_v41, %v2891_v44 }
 0x39d   :  { %v1527_v63 = vrot.slane %v1519_v12, 2 }
 0x39f   :  { %1207 = vrot.lane.b32.xlu1 %v1199_v27, %s2271_s14  ;;  %1205 = vrot.lane.b32.xlu0 %v1200_v23, %s2271_s14  ;;  %v1476_v27 = vsel %vm347_vm0, %v1474_v4, %v1475_v38  ;;  %v1529_v23 = vsel %vm700_vm1, %v1527_v63, %v1528_v3  ;;  %v1919_v4 = vmul.f32 %v1918_v13, %v2891_v44 }
 0x3a0   :  { %v1346_v63 = vmul.f32 %v1344_v34, %v2893_v48 }
 0x3a3   :  { %1235 = vrot.lane.b32.xlu1 %v1228_v37, %s2272_s18  ;;  %1233 = vrot.lane.b32.xlu0 %v1229_v47, %s2272_s18  ;;  %v1100_v37 = vstv %s1099_s16  ;;  %v1098_v47 = vstv %s1097_s17 }
 0x3a4   :  { %v1102_v11 = vmul.f32 %v1100_v37, %v2893_v48  ;;  %v1101_v2 = vmul.f32 %v1100_v37, %v2891_v44 }
 0x3a6   :  { %v1105_v29 = vadd.f32 %v1101_v2, %v1098_v47 }
 0x3a7   :  { %1239 = vrot.lane.b32.xlu1 %v1231_v36, %s2272_s18  ;;  %1237 = vrot.lane.b32.xlu0 %v1232_v0, %s2272_s18  ;;  %v1551_v36 = vmul.f32 %v1550_v50, %v2891_v44  ;;  %v1674_v0 = vstv %s2156_s19 }
 0x3a8   :  { %v1676_v14 = vmul.f32 %v1674_v0, %v2893_v48  ;;  %v1678_v24 = vmul.f32 %v1674_v0, %v2897_v8  ;;  %v1677_v55 = vmul.f32 %v1674_v0, %v2895_v57 }
 0x3a9   :  { %v1559_v6 = vrot.slane %v1551_v36, 2  ;;  %v1348_v36 = vmul.f32 %v1344_v34, %v2897_v8 }
 0x3aa   :  { %v1684_v59 = vrot.slane %v1676_v14, 1  ;;  %v1687_v62 = vrot.slane %v1678_v24, 1  ;;  %v1686_v18 = vrot.slane %v1677_v55, 1  ;;  %v1588_v24 = vstv %s2152_s25  ;;  %s2158_s25 = sld [smem:[#allocation7 + $0x18]] }
 0x3ab   :  { %1291 = vrot.lane.b32.xlu1 %v1284_v35, %s2271_s14  ;;  %1289 = vrot.lane.b32.xlu0 %v1285_v45, %s2271_s14  ;;  %v1532_v35 = vsel %vm700_vm1, %v1530_v33, %v1531_v42  ;;  %v1104_v45 = vmul.f32 %v1100_v37, %v2897_v8  ;;  %v1561_v26 = vsel %vm700_vm1, %v1559_v6, %v1560_v19  ;;  %v1930_v6 = vrot.slane %v1921_v39, 1 }
 0x3ac   :  { %v1688_v50 = vsel %vm347_vm0, %v1686_v18, %v1687_v62  ;;  %v1922_v33 = vmul.f32 %v1918_v13, %v2897_v8  ;;  %v1591_v39 = vmul.f32 %v1588_v24, %v2895_v57 }
 0x3ad   :  { %v1108_v54 = vadd.f32 %v1104_v45, %v1098_v47 }
 0x3af   :  { %1295 = vrot.lane.b32.xlu1 %v1287_v53, %s2271_s14  ;;  %1293 = vrot.lane.b32.xlu0 %v1288_v61, %s2271_s14  ;;  %v1106_v53 = vadd.f32 %v1102_v11, %v1098_v47  ;;  %v1675_v61 = vmul.f32 %v1674_v0, %v2891_v44  ;;  %v1347_v0 = vmul.f32 %v1344_v34, %v2895_v57 }
 0x3b0   :  { %v1589_v34 = vmul.f32 %v1588_v24, %v2891_v44 }
 0x3b3   :  { %1323 = vrot.lane.b32.xlu1 %v1316_v56, %s2272_s18  ;;  %1321 = vrot.lane.b32.xlu0 %v1317_v58, %s2272_s18  ;;  %v1103_v56 = vmul.f32 %v1100_v37, %v2895_v57 }
 0x3b5   :  { %v1107_v21 = vadd.f32 %v1103_v56, %v1098_v47 }
 0x3b7   :  { %1327 = vrot.lane.b32.xlu1 %v1319_v60, %s2272_s18  ;;  %1325 = vrot.lane.b32.xlu0 %v1320_v20, %s2272_s18  ;;  %v1683_v20 = vrot.slane %v1675_v61, 1 }
 0x3bb   :  { %1447 = vrot.lane.b32.xlu1 %v1440_v49, %s2271_s14  ;;  %1445 = vrot.lane.b32.xlu0 %v1441_v15, %s2271_s14 }
 0x3bf   :  { %1451 = vrot.lane.b32.xlu1 %v1443_v46, %s2271_s14  ;;  %1449 = vrot.lane.b32.xlu0 %v1444_v31, %s2271_s14  ;;  %v1564_v46 = vsel %vm700_vm1, %v1562_v30, %v1563_v16 }
 0x3c3   :  { %1479 = vrot.lane.b32.xlu1 %v1472_v52, %s2272_s18  ;;  %1477 = vrot.lane.b32.xlu0 %v1473_v25, %s2272_s18  ;;  %v1685_v52 = vsel %vm347_vm0, %v1683_v20, %v1684_v59 }
 0x3c7   :  { %1483 = vrot.lane.b32.xlu1 %v1475_v38, %s2272_s18  ;;  %1481 = vrot.lane.b32.xlu0 %v1476_v27, %s2272_s18  ;;  %v1920_v38 = vmul.f32 %v1918_v13, %v2893_v48 }
 0x3c9   :  { %v1928_v37 = vrot.slane %v1920_v38, 1  ;;  %v1762_v38 = vstv %s2159_s26 }
 0x3cb   :  { %1535 = vrot.lane.b32.xlu1 %v1528_v3, %s2271_s14  ;;  %1533 = vrot.lane.b32.xlu0 %v1529_v23, %s2271_s14  ;;  %v1342_v3 = vstv %s2141_s22  ;;  %v1706_v23 = vstv %s2157_s23  ;;  %s2155_s23 = sld [smem:[#allocation7 + $0x15]] }
 0x3cc   :  { %v1350_v47 = vadd.f32 %v1346_v63, %v1342_v3  ;;  %v1708_v2 = vmul.f32 %v1706_v23, %v2893_v48  ;;  %v1707_v5 = vmul.f32 %v1706_v23, %v2891_v44  ;;  %v1710_v61 = vmul.f32 %v1706_v23, %v2897_v8 }
 0x3cd   :  { %v1122_v28 = vpop.permute.xlu1 %1121  ;;  %v1120_v1 = vpop.permute.xlu0 %1119  ;;  %v1709_v56 = vmul.f32 %v1706_v23, %v2895_v57 }
 0x3ce   :  { %v1132_v58 = vadd.f32 %v1122_v28, %v1106_v53  ;;  %v1131_v60 = vadd.f32 %v1120_v1, %v1105_v29  ;;  %v1349_v28 = vadd.f32 %v1345_v7, %v1342_v3  ;;  %v1352_v53 = vadd.f32 %v1348_v36, %v1342_v3 }
 0x3cf   :  { %1539 = vrot.lane.b32.xlu1 %v1531_v42, %s2271_s14  ;;  %1537 = vrot.lane.b32.xlu0 %v1532_v35, %s2271_s14  ;;  %v1927_v42 = vrot.slane %v1919_v4, 1  ;;  %v1715_v14 = vrot.slane %v1707_v5, 1  ;;  %v1719_v55 = vrot.slane %v1710_v61, 1  ;;  %v1592_v7 = vmul.f32 %v1588_v24, %v2897_v8 }
 0x3d1   :  { %v1126_v10 = vpop.permute.xlu1 %1125  ;;  %v1124_v22 = vpop.permute.xlu0 %1123  ;;  %v1929_v35 = vsel %vm347_vm0, %v1927_v42, %v1928_v37  ;;  %v1764_v42 = vmul.f32 %v1762_v38, %v2893_v48 }
 0x3d2   :  { %v1134_v9 = vadd.f32 %v1126_v10, %v1108_v54  ;;  %v1133_v43 = vadd.f32 %v1124_v22, %v1107_v21  ;;  %v1716_v22 = vrot.slane %v1708_v2, 1  ;;  %v1718_v21 = vrot.slane %v1709_v56, 1 }
 0x3d3   :  { %1567 = vrot.lane.b32.xlu1 %v1560_v19, %s2272_s18  ;;  %1565 = vrot.lane.b32.xlu0 %v1561_v26, %s2272_s18  ;;  %v1931_v19 = vrot.slane %v1922_v33, 1  ;;  %v1351_v26 = vadd.f32 %v1347_v0, %v1342_v3  ;;  %v1763_v33 = vmul.f32 %v1762_v38, %v2891_v44 }
 0x3d4   :  { %v1717_v20 = vsel %vm347_vm0, %v1715_v14, %v1716_v22  ;;  %v1720_v4 = vsel %vm347_vm0, %v1718_v21, %v1719_v55 }
 0x3d5   :  { %v1148_v17 = vpop.permute.xlu1 %1147  ;;  %v1146_v49 = vpop.permute.xlu0 %1145 }
 0x3d6   :  { %v3050_v51 = vadd.f32 %v1148_v17, %v1132_v58  ;;  %v3052_v15 = vadd.f32 %v1146_v49, %v1131_v60  ;;  %v1932_v58 = vsel %vm347_vm0, %v1930_v6, %v1931_v19  ;;  %v1950_v60 = vstv %s3074_s24  ;;  %s2165_s24 = sld [smem:[#allocation7 + $0x1e]] }
 0x3d7   :  { %1571 = vrot.lane.b32.xlu1 %v1563_v16, %s2272_s18  ;;  %1569 = vrot.lane.b32.xlu0 %v1564_v46, %s2272_s18  ;;  %v1954_v18 = vmul.f32 %v1950_v60, %v2897_v8  ;;  %v1766_v6 = vmul.f32 %v1762_v38, %v2897_v8 }
 0x3d9   :  { %v1152_v41 = vpop.permute.xlu1 %1151  ;;  %v1150_v31 = vpop.permute.xlu0 %1149 }
 0x3da   :  { %v3059_v12 = vadd.f32 %v1152_v41, %v1134_v9  ;;  %v3061_v25 = vadd.f32 %v1150_v31, %v1133_v43  ;;  %v1952_v9 = vmul.f32 %v1950_v60, %v2893_v48  ;;  %v1951_v43 = vmul.f32 %v1950_v60, %v2891_v44 }
 0x3db   :  { %1691 = vrot.lane.b32.xlu1 %v1684_v59, %s2271_s14  ;;  %1689 = vrot.lane.b32.xlu0 %v1685_v52, %s2271_s14  ;;  %v1586_v41 = vstv %s2151_s3  ;;  %v1590_v31 = vmul.f32 %v1588_v24, %v2893_v48  ;;  %s2168_s3 = sld [smem:[#allocation7 + $0x21]] }
 0x3dc   :  { %v1960_v3 = vrot.slane %v1952_v9, 1  ;;  %v1959_v63 = vrot.slane %v1951_v43, 1  ;;  %v1596_v2 = vadd.f32 %v1592_v7, %v1586_v41 }
 0x3dd   :  { %v1366_v27 = vpop.permute.xlu1 %1365  ;;  %v1364_v32 = vpop.permute.xlu0 %1363 }
 0x3de   :  { %v1376_v40 = vadd.f32 %v1366_v27, %v1350_v47  ;;  %v1375_v45 = vadd.f32 %v1364_v32, %v1349_v28  ;;  %v1953_v27 = vmul.f32 %v1950_v60, %v2895_v57  ;;  %v1594_v32 = vadd.f32 %v1590_v31, %v1586_v41 }
 0x3df   :  { %1695 = vrot.lane.b32.xlu1 %v1687_v62, %s2271_s14  ;;  %1693 = vrot.lane.b32.xlu0 %v1688_v50, %s2271_s14  ;;  %v1593_v50 = vadd.f32 %v1589_v34, %v1586_v41  ;;  %v1961_v36 = vsel %vm347_vm0, %v1959_v63, %v1960_v3  ;;  %v1963_v47 = vrot.slane %v1954_v18, 1  ;;  %v1832_v60 = vstv %s2162_s28 }
 0x3e0   :  { %v1962_v28 = vrot.slane %v1953_v27, 1  ;;  %v1834_v21 = vmul.f32 %v1832_v60, %v2893_v48  ;;  %v1833_v43 = vmul.f32 %v1832_v60, %v2891_v44 }
 0x3e1   :  { %v1370_v11 = vpop.permute.xlu1 %1369  ;;  %v1368_v1 = vpop.permute.xlu0 %1367 }
 0x3e2   :  { %v1378_v54 = vadd.f32 %v1370_v11, %v1352_v53  ;;  %v1377_v17 = vadd.f32 %v1368_v1, %v1351_v26 }
 0x3e3   :  { %1935 = vrot.lane.b32.xlu1 %v1928_v37, %s2271_s14  ;;  %1933 = vrot.lane.b32.xlu0 %v1929_v35, %s2271_s14  ;;  %v1772_v35 = vrot.slane %v1764_v42, 2 }
 0x3e5   :  { %v1392_v29 = vpop.permute.xlu1 %1391  ;;  %v1390_v10 = vpop.permute.xlu0 %1389 }
 0x3e6   :  { %v3085_v16 = vadd.f32 %v1392_v29, %v1376_v40  ;;  %v3087_v30 = vadd.f32 %v1390_v10, %v1375_v45  ;;  %v1765_v40 = vmul.f32 %v1762_v38, %v2895_v57  ;;  %v1595_v45 = vadd.f32 %v1591_v39, %v1586_v41 }
 0x3e7   :  { %1939 = vrot.lane.b32.xlu1 %v1931_v19, %s2271_s14  ;;  %1937 = vrot.lane.b32.xlu0 %v1932_v58, %s2271_s14  ;;  %v1771_v19 = vrot.slane %v1763_v33, 2  ;;  %v1964_v10 = vsel %vm347_vm0, %v1962_v28, %v1963_v47 }
 0x3e9   :  { %v1396_v49 = vpop.permute.xlu1 %1395  ;;  %v1394_v59 = vpop.permute.xlu0 %1393  ;;  %v1773_v58 = vsel %vm700_vm1, %v1771_v19, %v1772_v35 }
 0x3ea   :  { %v3094_v46 = vadd.f32 %v1396_v49, %v1378_v54  ;;  %v3096_v13 = vadd.f32 %v1394_v59, %v1377_v17  ;;  %v1775_v54 = vrot.slane %v1766_v6, 2  ;;  %v1774_v17 = vrot.slane %v1765_v40, 2 }
 0x3eb   :  { %1723 = vrot.lane.b32.xlu1 %v1716_v22, %s2272_s18  ;;  %1721 = vrot.lane.b32.xlu0 %v1717_v20, %s2272_s18  ;;  %v2006_v22 = vstv %s3109_s27 }
 0x3ec   :  { %v2008_v20 = vmul.f32 %v2006_v22, %v2893_v48  ;;  %v2007_v24 = vmul.f32 %v2006_v22, %v2891_v44  ;;  %v2010_v31 = vmul.f32 %v2006_v22, %v2897_v8  ;;  %v1776_v34 = vsel %vm700_vm1, %v1774_v17, %v1775_v54 }
 0x3ed   :  { %v1610_v52 = vpop.permute.xlu1 %1609  ;;  %v1608_v62 = vpop.permute.xlu0 %1607  ;;  %v2009_v38 = vmul.f32 %v2006_v22, %v2895_v57 }
 0x3ee   :  { %v1620_v11 = vadd.f32 %v1610_v52, %v1594_v32  ;;  %v1619_v1 = vadd.f32 %v1608_v62, %v1593_v50  ;;  %v1794_v52 = vstv %s2160_s30  ;;  %v2016_v62 = vrot.slane %v2008_v20, 2 }
 0x3ef   :  { %1727 = vrot.lane.b32.xlu1 %v1719_v55, %s2272_s18  ;;  %1725 = vrot.lane.b32.xlu0 %v1720_v4, %s2272_s18  ;;  %v1830_v55 = vstv %s2161_s29  ;;  %v2015_v18 = vrot.slane %v2007_v24, 2  ;;  %v1836_v4 = vmul.f32 %v1832_v60, %v2897_v8  ;;  %v1796_v32 = vmul.f32 %v1794_v52, %v2893_v48 }
 0x3f0   :  { %v1837_v63 = vadd.f32 %v1833_v43, %v1830_v55  ;;  %v1795_v50 = vmul.f32 %v1794_v52, %v2891_v44  ;;  %v2019_v42 = vrot.slane %v2010_v31, 2  ;;  %v2018_v33 = vrot.slane %v2009_v38, 2 }
 0x3f1   :  { %v1614_v23 = vpop.permute.xlu1 %1613  ;;  %v1612_v37 = vpop.permute.xlu0 %1611  ;;  %v1162_v24 = vstv %s2135_s7 }
 0x3f2   :  { %v1622_v14 = vadd.f32 %v1614_v23, %v1596_v2  ;;  %v1621_v61 = vadd.f32 %v1612_v37, %v1595_v45  ;;  %v1835_v23 = vmul.f32 %v1832_v60, %v2895_v57  ;;  %v2017_v37 = vsel %vm700_vm1, %v2015_v18, %v2016_v62 }
 0x3f3   :  { %1967 = vrot.lane.b32.xlu1 %v1960_v3, %s2272_s18  ;;  %1965 = vrot.lane.b32.xlu0 %v1961_v36, %s2272_s18  ;;  %v1838_v3 = vadd.f32 %v1834_v21, %v1830_v55  ;;  %v1803_v2 = vrot.slane %v1795_v50, 2  ;;  %v2020_v40 = vsel %vm700_vm1, %v2018_v33, %v2019_v42  ;;  %v2038_v45 = vstv %s3144_s6 }
 0x3f4   :  { %v2040_v17 = vmul.f32 %v2038_v45, %v2893_v48  ;;  %v2039_v20 = vmul.f32 %v2038_v45, %v2891_v44 }
 0x3f5   :  { %v1636_v5 = vpop.permute.xlu1 %1635  ;;  %v1634_v0 = vpop.permute.xlu0 %1633 }
 0x3f6   :  { %v3120_v53 = vadd.f32 %v1636_v5, %v1620_v11  ;;  %v3122_v29 = vadd.f32 %v1634_v0, %v1619_v1  ;;  %v1804_v1 = vrot.slane %v1796_v32, 2  ;;  %v1798_v5 = vmul.f32 %v1794_v52, %v2897_v8 }
 0x3f7   :  { %1971 = vrot.lane.b32.xlu1 %v1963_v47, %s2272_s18  ;;  %1969 = vrot.lane.b32.xlu0 %v1964_v10, %s2272_s18  ;;  %v1840_v47 = vadd.f32 %v1836_v4, %v1830_v55  ;;  %v1797_v0 = vmul.f32 %v1794_v52, %v2895_v57  ;;  %v2047_v31 = vrot.slane %v2039_v20, 2  ;;  %v2041_v52 = vmul.f32 %v2038_v45, %v2895_v57 }
 0x3f9   :  { %v1640_v56 = vpop.permute.xlu1 %1639  ;;  %v1638_v26 = vpop.permute.xlu0 %1637 }
 0x3fa   :  { %v3129_v49 = vadd.f32 %v1640_v56, %v1622_v14  ;;  %v3131_v59 = vadd.f32 %v1638_v26, %v1621_v61  ;;  %v1805_v56 = vsel %vm700_vm1, %v1803_v2, %v1804_v1  ;;  %v1807_v26 = vrot.slane %v1798_v5, 2 }
 0x3fb   :  { %1779 = vrot.lane.b32.xlu1 %v1772_v35, %s2271_s14  ;;  %1777 = vrot.lane.b32.xlu0 %v1773_v58, %s2271_s14  ;;  %v1839_v35 = vadd.f32 %v1835_v23, %v1830_v55  ;;  %v1806_v58 = vrot.slane %v1797_v0, 2 }
 0x3fd   :  { %v1854_v9 = vpop.permute.xlu1 %1853  ;;  %v1852_v41 = vpop.permute.xlu0 %1851  ;;  %v1808_v43 = vsel %vm700_vm1, %v1806_v58, %v1807_v26 }
 0x3fe   :  { %v1864_v39 = vadd.f32 %v1854_v9, %v1838_v3  ;;  %v1863_v36 = vadd.f32 %v1852_v41, %v1837_v63  ;;  %v2042_v9 = vmul.f32 %v2038_v45, %v2897_v8  ;;  %v2048_v41 = vrot.slane %v2040_v17, 2 }
 0x3ff   :  { %1783 = vrot.lane.b32.xlu1 %v1775_v54, %s2271_s14  ;;  %1781 = vrot.lane.b32.xlu0 %v1776_v34, %s2271_s14  ;;  %v1164_v34 = vmul.f32 %v1162_v24, %v2893_v48  ;;  %v2050_v63 = vrot.slane %v2041_v52, 2 }
 0x400   :  { %v2049_v4 = vsel %vm700_vm1, %v2047_v31, %v2048_v41  ;;  %v2051_v3 = vrot.slane %v2042_v9, 2 }
 0x401   :  { %v1858_v27 = vpop.permute.xlu1 %1857  ;;  %v1856_v7 = vpop.permute.xlu0 %1855  ;;  %v1172_v32 = vrot.slane %v1164_v34, 1 }
 0x402   :  { %v1866_v10 = vadd.f32 %v1858_v27, %v1840_v47  ;;  %v1865_v22 = vadd.f32 %v1856_v7, %v1839_v35  ;;  %v1166_v27 = vmul.f32 %v1162_v24, %v2897_v8  ;;  %v1165_v7 = vmul.f32 %v1162_v24, %v2895_v57 }
 0x403   :  { %2023 = vrot.lane.b32.xlu1 %v2016_v62, %s2271_s14  ;;  %2021 = vrot.lane.b32.xlu0 %v2017_v37, %s2271_s14  ;;  %v1163_v62 = vmul.f32 %v1162_v24, %v2891_v44  ;;  %v1182_v5 = vadd.f32 %v1172_v32, %v3050_v51 }
 0x405   :  { %v1880_v28 = vpop.permute.xlu1 %1879  ;;  %v1878_v11 = vpop.permute.xlu0 %1877  ;;  %v1171_v50 = vrot.slane %v1163_v62, 1 }
 0x406   :  { %v3155_v19 = vadd.f32 %v1880_v28, %v1864_v39  ;;  %v3157_v6 = vadd.f32 %v1878_v11, %v1863_v36  ;;  %v1175_v39 = vrot.slane %v1166_v27, 1  ;;  %v1174_v36 = vrot.slane %v1165_v7, 1 }
 0x407   :  { %2027 = vrot.lane.b32.xlu1 %v2019_v42, %s2271_s14  ;;  %2025 = vrot.lane.b32.xlu0 %v2020_v40, %s2271_s14  ;;  %s2138_s14 = sld [smem:[#allocation7 + $0x6]]  ;;  %v2052_v42 = vsel %vm700_vm1, %v2050_v63, %v2051_v3  ;;  %v1173_v47 = vsel %vm347_vm0, %v1171_v50, %v1172_v32 }
 0x408   :  { %v1181_v0 = vadd.f32 %v1173_v47, %v3052_v15  ;;  %v1176_v45 = vsel %vm347_vm0, %v1174_v36, %v1175_v39  ;;  %v1184_v58 = vadd.f32 %v1175_v39, %v3059_v12 }
 0x409   :  { %v1884_v14 = vpop.permute.xlu1 %1883  ;;  %v1882_v61 = vpop.permute.xlu0 %1881  ;;  %v1183_v17 = vadd.f32 %v1176_v45, %v3061_v25  ;;  %v1494_v45 = vstv %s2148_s0 }
 0x40a   :  { %v3164_v60 = vadd.f32 %v1884_v14, %v1866_v10  ;;  %v3166_v54 = vadd.f32 %v1882_v61, %v1865_v22 }
 0x40b   :  { %1811 = vrot.lane.b32.xlu1 %v1804_v1, %s2272_s18  ;;  %1809 = vrot.lane.b32.xlu0 %v1805_v56, %s2272_s18 }
 0x40d   :  { %v1204_v55 = vpop.permute.xlu1 %1203  ;;  %v1202_v21 = vpop.permute.xlu0 %1201  ;;  %v1250_v33 = vstv %s2138_s14 }
 0x40e   :  { %v1252_v1 = vmul.f32 %v1250_v33, %v2893_v48  ;;  %v1251_v2 = vmul.f32 %v1250_v33, %v2891_v44  ;;  %v1214_v35 = vadd.f32 %v1204_v55, %v1182_v5  ;;  %v1213_v40 = vadd.f32 %v1202_v21, %v1181_v0 }
 0x40f   :  { %1815 = vrot.lane.b32.xlu1 %v1807_v26, %s2272_s18  ;;  %1813 = vrot.lane.b32.xlu0 %v1808_v43, %s2272_s18  ;;  %v1254_v56 = vmul.f32 %v1250_v33, %v2897_v8  ;;  %v1253_v26 = vmul.f32 %v1250_v33, %v2895_v57 }
 0x410   :  { %v1260_v10 = vrot.slane %v1252_v1, 2  ;;  %v1259_v14 = vrot.slane %v1251_v2, 2 }
 0x411   :  { %v1208_v18 = vpop.permute.xlu1 %1207  ;;  %v1206_v38 = vpop.permute.xlu0 %1205  ;;  %v1263_v21 = vrot.slane %v1254_v56, 2  ;;  %v1262_v43 = vrot.slane %v1253_v26, 2 }
 0x412   :  { %v1216_v24 = vadd.f32 %v1208_v18, %v1184_v58  ;;  %v1215_v15 = vadd.f32 %v1206_v38, %v1183_v17  ;;  %v1261_v55 = vsel %vm700_vm1, %v1259_v14, %v1260_v10  ;;  %v1496_v58 = vmul.f32 %v1494_v45, %v2893_v48 }
 0x413   :  { %2055 = vrot.lane.b32.xlu1 %v2048_v41, %s2272_s18  ;;  %2053 = vrot.lane.b32.xlu0 %v2049_v4, %s2272_s18  ;;  %v1264_v12 = vsel %vm700_vm1, %v1262_v43, %v1263_v21 }
 0x415   :  { %v1236_v23 = vpop.permute.xlu1 %1235  ;;  %v1234_v37 = vpop.permute.xlu0 %1233 }
 0x416   :  { %v1246_v20 = vadd.f32 %v1236_v23, %v1214_v35  ;;  %v1245_v51 = vadd.f32 %v1234_v37, %v1213_v40 }
 0x417   :  { %2059 = vrot.lane.b32.xlu1 %v2051_v3, %s2272_s18  ;;  %2057 = vrot.lane.b32.xlu0 %v2052_v42, %s2272_s18  ;;  %s2145_s18 = sld [smem:[#allocation7 + $0xc]] }
 0x418   :  { %v1270_v34 = vadd.f32 %v1260_v10, %v1246_v20  ;;  %v1269_v62 = vadd.f32 %v1261_v55, %v1245_v51  ;;  %v1495_v55 = vmul.f32 %v1494_v45, %v2891_v44 }
 0x419   :  { %v1240_v28 = vpop.permute.xlu1 %1239  ;;  %v1238_v11 = vpop.permute.xlu0 %1237 }
 0x41a   :  { %v1248_v31 = vadd.f32 %v1240_v28, %v1216_v24  ;;  %v1247_v52 = vadd.f32 %v1238_v11, %v1215_v15 }
 0x41c   :  { %v1272_v27 = vadd.f32 %v1263_v21, %v1248_v31  ;;  %v1271_v7 = vadd.f32 %v1264_v12, %v1247_v52  ;;  %v1498_v31 = vmul.f32 %v1494_v45, %v2897_v8  ;;  %v1497_v12 = vmul.f32 %v1494_v45, %v2895_v57 }
 0x41d   :  { %v1292_v22 = vpop.permute.xlu1 %1291  ;;  %v1290_v61 = vpop.permute.xlu0 %1289  ;;  %v1406_v2 = vstv %s2145_s18 }
 0x41e   :  { %v1302_v4 = vadd.f32 %v1292_v22, %v1270_v34  ;;  %v1301_v3 = vadd.f32 %v1290_v61, %v1269_v62  ;;  %v1408_v5 = vmul.f32 %v1406_v2, %v2893_v48  ;;  %v1407_v0 = vmul.f32 %v1406_v2, %v2891_v44 }
 0x41f   :  { %v1410_v14 = vmul.f32 %v1406_v2, %v2897_v8  ;;  %v1409_v61 = vmul.f32 %v1406_v2, %v2895_v57  ;;  %v1504_v34 = vrot.slane %v1496_v58, 2 }
 0x420   :  { %v1416_v10 = vrot.slane %v1408_v5, 1  ;;  %v1415_v22 = vrot.slane %v1407_v0, 1 }
 0x421   :  { %v1296_v9 = vpop.permute.xlu1 %1295  ;;  %v1294_v41 = vpop.permute.xlu0 %1293  ;;  %v1419_v20 = vrot.slane %v1410_v14, 1  ;;  %v1418_v51 = vrot.slane %v1409_v61, 1 }
 0x422   :  { %v1304_v32 = vadd.f32 %v1296_v9, %v1272_v27  ;;  %v1303_v50 = vadd.f32 %v1294_v41, %v1271_v7  ;;  %v1417_v17 = vsel %vm347_vm0, %v1415_v22, %v1416_v10  ;;  %v1426_v21 = vadd.f32 %v1416_v10, %v3085_v16 }
 0x423   :  { %v1425_v9 = vadd.f32 %v1417_v17, %v3087_v30  ;;  %v1420_v52 = vsel %vm347_vm0, %v1418_v51, %v1419_v20 }
 0x425   :  { %v1324_v63 = vpop.permute.xlu1 %1323  ;;  %v1322_v25 = vpop.permute.xlu0 %1321 }
 0x426   :  { %v1334_v18 = vadd.f32 %v1324_v63, %v1302_v4  ;;  %v1333_v38 = vadd.f32 %v1322_v25, %v1301_v3  ;;  %v1503_v4 = vrot.slane %v1495_v55, 2  ;;  %v1428_v63 = vadd.f32 %v1419_v20, %v3094_v46 }
 0x427   :  { %v1427_v25 = vadd.f32 %v1420_v52, %v3096_v13 }
 0x428   :  { %v1338_v23 = vmax.f32 %v1334_v18, 0.0  ;;  %v1337_v37 = vmax.f32 %v1333_v38, 0.0  ;;  %v1505_v18 = vsel %vm700_vm1, %v1503_v4, %v1504_v34  ;;  %v1507_v38 = vrot.slane %v1498_v31, 2 }
 0x429   :  { %v1328_v42 = vpop.permute.xlu1 %1327  ;;  %v1326_v33 = vpop.permute.xlu0 %1325 }
 0x42a   :  { %2076 = vst.msk [vmem:[%s3352_s5 + $0x8] sm:$0xf] %vm2075_vm4, %v1338_v23  ;;  %v1336_v39 = vadd.f32 %v1328_v42, %v1304_v32  ;;  %v1335_v36 = vadd.f32 %v1326_v33, %v1303_v50  ;;  %v1506_v50 = vrot.slane %v1497_v12, 2 }
 0x42b   :  { %2074 = vst.msk [vmem:[%s3352_s5] sm:$0xff] %vm2073_vm5, %v1337_v37 }
 0x42c   :  { %v1340_v47 = vmax.f32 %v1336_v39, 0.0  ;;  %v1339_v28 = vmax.f32 %v1335_v36, 0.0  ;;  %v1508_v46 = vsel %vm700_vm1, %v1506_v50, %v1507_v38 }
 0x42d   :  { %v1448_v11 = vpop.permute.xlu1 %1447  ;;  %v1446_v1 = vpop.permute.xlu0 %1445 }
 0x42e   :  { %2084 = vst.msk [vmem:[%s3352_s5 + $0x48] sm:$0xf] %vm2075_vm4, %v1340_v47  ;;  %v1458_v43 = vadd.f32 %v1448_v11, %v1426_v21  ;;  %v1457_v41 = vadd.f32 %v1446_v1, %v1425_v9 }
 0x42f   :  { %2083 = vst.msk [vmem:[%s3352_s5 + $0x40] sm:$0xff] %vm2073_vm5, %v1339_v28 }
 0x431   :  { %v1452_v35 = vpop.permute.xlu1 %1451  ;;  %v1450_v40 = vpop.permute.xlu0 %1449 }
 0x432   :  { %v1460_v7 = vadd.f32 %v1452_v35, %v1428_v63  ;;  %v1459_v30 = vadd.f32 %v1450_v40, %v1427_v25 }
 0x435   :  { %v1480_v56 = vpop.permute.xlu1 %1479  ;;  %v1478_v26 = vpop.permute.xlu0 %1477 }
 0x436   :  { %v1490_v27 = vadd.f32 %v1480_v56, %v1458_v43  ;;  %v1489_v16 = vadd.f32 %v1478_v26, %v1457_v41 }
 0x438   :  { %v1514_v33 = vadd.f32 %v1504_v34, %v1490_v27  ;;  %v1513_v39 = vadd.f32 %v1505_v18, %v1489_v16  ;;  %v1894_v27 = vstv %s2165_s24 }
 0x439   :  { %v1484_v24 = vpop.permute.xlu1 %1483  ;;  %v1482_v15 = vpop.permute.xlu0 %1481  ;;  %v1896_v50 = vmul.f32 %v1894_v27, %v2893_v48 }
 0x43a   :  { %v1492_v37 = vadd.f32 %v1484_v24, %v1460_v7  ;;  %v1491_v42 = vadd.f32 %v1482_v15, %v1459_v30 }
 0x43c   :  { %v1516_v11 = vadd.f32 %v1507_v38, %v1492_v37  ;;  %v1515_v1 = vadd.f32 %v1508_v46, %v1491_v42  ;;  %v1898_v37 = vmul.f32 %v1894_v27, %v2897_v8  ;;  %v1897_v42 = vmul.f32 %v1894_v27, %v2895_v57 }
 0x43d   :  { %v1536_v62 = vpop.permute.xlu1 %1535  ;;  %v1534_v3 = vpop.permute.xlu0 %1533 }
 0x43e   :  { %v1546_v36 = vadd.f32 %v1536_v62, %v1514_v33  ;;  %v1545_v47 = vadd.f32 %v1534_v3, %v1513_v39  ;;  %v1650_v62 = vstv %s2155_s23 }
 0x43f   :  { %v1652_v4 = vmul.f32 %v1650_v62, %v2893_v48  ;;  %v1651_v3 = vmul.f32 %v1650_v62, %v2891_v44  ;;  %v1654_v25 = vmul.f32 %v1650_v62, %v2897_v8  ;;  %v1653_v30 = vmul.f32 %v1650_v62, %v2895_v57 }
 0x441   :  { %v1540_v32 = vpop.permute.xlu1 %1539  ;;  %v1538_v23 = vpop.permute.xlu0 %1537  ;;  %v1660_v16 = vrot.slane %v1652_v4, 1  ;;  %v1659_v7 = vrot.slane %v1651_v3, 1  ;;  %v1663_v33 = vrot.slane %v1654_v25, 1 }
 0x442   :  { %v1548_v0 = vadd.f32 %v1540_v32, %v1516_v11  ;;  %v1547_v35 = vadd.f32 %v1538_v23, %v1515_v1  ;;  %v1738_v32 = vstv %s2158_s25  ;;  %v1895_v23 = vmul.f32 %v1894_v27, %v2891_v44 }
 0x443   :  { %v1661_v39 = vsel %vm347_vm0, %v1659_v7, %v1660_v16  ;;  %v1739_v46 = vmul.f32 %v1738_v32, %v2891_v44  ;;  %v1670_v11 = vadd.f32 %v1660_v16, %v3120_v53  ;;  %v1672_v53 = vadd.f32 %v1663_v33, %v3129_v49 }
 0x444   :  { %v1669_v1 = vadd.f32 %v1661_v39, %v3122_v29 }
 0x445   :  { %v1568_v28 = vpop.permute.xlu1 %1567  ;;  %v1566_v13 = vpop.permute.xlu0 %1565 }
 0x446   :  { %v1578_v2 = vadd.f32 %v1568_v28, %v1546_v36  ;;  %v1577_v5 = vadd.f32 %v1566_v13, %v1545_v47  ;;  %v1662_v36 = vrot.slane %v1653_v30, 1  ;;  %v1740_v47 = vmul.f32 %v1738_v32, %v2893_v48 }
 0x448   :  { %v1582_v40 = vmax.f32 %v1578_v2, 0.0  ;;  %v1581_v45 = vmax.f32 %v1577_v5, 0.0  ;;  %v1982_v2 = vstv %s2168_s3  ;;  %v1904_v5 = vrot.slane %v1896_v50, 1 }
 0x449   :  { %v1572_v10 = vpop.permute.xlu1 %1571  ;;  %v1570_v22 = vpop.permute.xlu0 %1569  ;;  %v1983_v16 = vmul.f32 %v1982_v2, %v2891_v44 }
 0x44a   :  { %2078 = vst.msk [vmem:[%s3352_s5 + $0x18] sm:$0xf] %vm2075_vm4, %v1582_v40  ;;  %v1580_v14 = vadd.f32 %v1572_v10, %v1548_v0  ;;  %v1579_v61 = vadd.f32 %v1570_v22, %v1547_v35  ;;  %v1903_v0 = vrot.slane %v1895_v23, 1  ;;  %v1907_v35 = vrot.slane %v1898_v37, 1 }
 0x44b   :  { %2077 = vst.msk [vmem:[%s3352_s5 + $0x10] sm:$0xff] %vm2073_vm5, %v1581_v45  ;;  %v1906_v40 = vrot.slane %v1897_v42, 1  ;;  %v1742_v22 = vmul.f32 %v1738_v32, %v2897_v8  ;;  %v1914_v49 = vadd.f32 %v1904_v5, %v3155_v19  ;;  %v1991_v19 = vrot.slane %v1983_v16, 2 }
 0x44c   :  { %v1584_v56 = vmax.f32 %v1580_v14, 0.0  ;;  %v1583_v26 = vmax.f32 %v1579_v61, 0.0  ;;  %v1741_v14 = vmul.f32 %v1738_v32, %v2895_v57  ;;  %v1664_v61 = vsel %vm347_vm0, %v1662_v36, %v1663_v33 }
 0x44d   :  { %v1692_v58 = vpop.permute.xlu1 %1691  ;;  %v1690_v17 = vpop.permute.xlu0 %1689  ;;  %v1671_v29 = vadd.f32 %v1664_v61, %v3131_v59  ;;  %v1905_v27 = vsel %vm347_vm0, %v1903_v0, %v1904_v5  ;;  %v1751_v32 = vrot.slane %v1742_v22, 2 }
 0x44e   :  { %2086 = vst.msk [vmem:[%s3352_s5 + $0x58] sm:$0xf] %vm2075_vm4, %v1584_v56  ;;  %v1702_v45 = vadd.f32 %v1692_v58, %v1670_v11  ;;  %v1701_v10 = vadd.f32 %v1690_v17, %v1669_v1  ;;  %v1748_v56 = vrot.slane %v1740_v47, 2  ;;  %v1908_v58 = vsel %vm347_vm0, %v1906_v40, %v1907_v35 }
 0x44f   :  { %2085 = vst.msk [vmem:[%s3352_s5 + $0x50] sm:$0xff] %vm2073_vm5, %v1583_v26  ;;  %v1747_v26 = vrot.slane %v1739_v46, 2  ;;  %v1984_v17 = vmul.f32 %v1982_v2, %v2893_v48  ;;  %v1750_v50 = vrot.slane %v1741_v14, 2  ;;  %v1913_v59 = vadd.f32 %v1905_v27, %v3157_v6 }
 0x450   :  { %v1916_v46 = vadd.f32 %v1907_v35, %v3164_v60 }
 0x451   :  { %v3247_v20 = vpop.permute.xlu1 %1695  ;;  %v3249_v51 = vpop.permute.xlu0 %1693  ;;  %v1992_v39 = vrot.slane %v1984_v17, 2  ;;  %v1752_v47 = vsel %vm700_vm1, %v1750_v50, %v1751_v32 }
 0x452   :  { %v1704_v7 = vadd.f32 %v3247_v20, %v1672_v53  ;;  %v1703_v30 = vadd.f32 %v3249_v51, %v1671_v29 }
 0x455   :  { %v3251_v24 = vpop.permute.xlu1 %1935  ;;  %v3253_v15 = vpop.permute.xlu0 %1933 }
 0x456   :  { %v1946_v51 = vadd.f32 %v3251_v24, %v1914_v49  ;;  %v1945_v33 = vadd.f32 %v3253_v15, %v1913_v59 }
 0x459   :  { %v3255_v55 = vpop.permute.xlu1 %1939  ;;  %v3257_v21 = vpop.permute.xlu0 %1937 }
 0x45d   :  { %v1724_v9 = vpop.permute.xlu1 %1723  ;;  %v1722_v43 = vpop.permute.xlu0 %1721 }
 0x45e   :  { %v1734_v3 = vadd.f32 %v1724_v9, %v1702_v45  ;;  %v1733_v25 = vadd.f32 %v1722_v43, %v1701_v10  ;;  %v1749_v9 = vsel %vm700_vm1, %v1747_v26, %v1748_v56  ;;  %v1986_v43 = vmul.f32 %v1982_v2, %v2897_v8 }
 0x45f   :  { %v1985_v8 = vmul.f32 %v1982_v2, %v2895_v57  ;;  %v1993_v57 = vsel %vm700_vm1, %v1991_v19, %v1992_v39 }
 0x460   :  { %v1758_v42 = vadd.f32 %v1748_v56, %v1734_v3  ;;  %v1757_v20 = vadd.f32 %v1749_v9, %v1733_v25  ;;  %v1995_v10 = vrot.slane %v1986_v43, 2 }
 0x461   :  { %v3259_v41 = vpop.permute.xlu1 %1727  ;;  %v3261_v31 = vpop.permute.xlu0 %1725 }
 0x462   :  { %v1736_v48 = vadd.f32 %v3259_v41, %v1704_v7  ;;  %v1735_v44 = vadd.f32 %v3261_v31, %v1703_v30  ;;  %v1915_v41 = vadd.f32 %v1908_v58, %v3166_v54 }
 0x464   :  { %v1760_v5 = vadd.f32 %v1751_v32, %v1736_v48  ;;  %v1759_v15 = vadd.f32 %v1752_v47, %v1735_v44 }
 0x465   :  { %v3263_v52 = vpop.permute.xlu1 %1967  ;;  %v3265_v34 = vpop.permute.xlu0 %1965 }
 0x466   :  { %v1978_v31 = vadd.f32 %v3263_v52, %v1946_v51  ;;  %v1977_v11 = vadd.f32 %v3265_v34, %v1945_v33  ;;  %v1994_v34 = vrot.slane %v1985_v8, 2 }
 0x468   :  { %v2002_v45 = vadd.f32 %v1992_v39, %v1978_v31  ;;  %v2001_v52 = vadd.f32 %v1993_v57, %v1977_v11 }
 0x469   :  { %v3269_v12 = vpop.permute.xlu1 %1971  ;;  %v3271_v63 = vpop.permute.xlu0 %1969 }
 0x46d   :  { %v1780_v18 = vpop.permute.xlu1 %1779  ;;  %v1778_v38 = vpop.permute.xlu0 %1777 }
 0x46e   :  { %v1790_v36 = vadd.f32 %v1780_v18, %v1758_v42  ;;  %v1789_v6 = vadd.f32 %v1778_v38, %v1757_v20  ;;  %v1948_v18 = vadd.f32 %v3255_v55, %v1916_v46  ;;  %v1947_v38 = vadd.f32 %v3257_v21, %v1915_v41 }
 0x470   :  { %v1980_v61 = vadd.f32 %v3269_v12, %v1948_v18  ;;  %v1979_v56 = vadd.f32 %v3271_v63, %v1947_v38  ;;  %v1996_v12 = vsel %vm700_vm1, %v1994_v34, %v1995_v10 }
 0x471   :  { %v1784_v28 = vpop.permute.xlu1 %1783  ;;  %v1782_v13 = vpop.permute.xlu0 %1781 }
 0x472   :  { %v1792_v2 = vadd.f32 %v1784_v28, %v1760_v5  ;;  %v1791_v60 = vadd.f32 %v1782_v13, %v1759_v15  ;;  %v2004_v3 = vadd.f32 %v1995_v10, %v1980_v61  ;;  %v2003_v25 = vadd.f32 %v1996_v12, %v1979_v56 }
 0x475   :  { %v2024_v62 = vpop.permute.xlu1 %2023  ;;  %v2022_v4 = vpop.permute.xlu0 %2021 }
 0x476   :  { %v2034_v28 = vadd.f32 %v2024_v62, %v2002_v45  ;;  %v2033_v13 = vadd.f32 %v2022_v4, %v2001_v52 }
 0x479   :  { %v2028_v23 = vpop.permute.xlu1 %2027  ;;  %v2026_v37 = vpop.permute.xlu0 %2025 }
 0x47a   :  { %v2036_v27 = vadd.f32 %v2028_v23, %v2004_v3  ;;  %v2035_v58 = vadd.f32 %v2026_v37, %v2003_v25 }
 0x47d   :  { %v1812_v1 = vpop.permute.xlu1 %1811  ;;  %v1810_v24 = vpop.permute.xlu0 %1809 }
 0x47e   :  { %v1822_v0 = vadd.f32 %v1812_v1, %v1790_v36  ;;  %v1821_v40 = vadd.f32 %v1810_v24, %v1789_v6 }
 0x480   :  { %v1826_v35 = vmax.f32 %v1822_v0, 0.0  ;;  %v1825_v54 = vmax.f32 %v1821_v40, 0.0 }
 0x481   :  { %v1816_v22 = vpop.permute.xlu1 %1815  ;;  %v1814_v14 = vpop.permute.xlu0 %1813 }
 0x482   :  { %2080 = vst.msk [vmem:[%s3352_s5 + $0x28] sm:$0xf] %vm2075_vm4, %v1826_v35  ;;  %v1824_v55 = vadd.f32 %v1816_v22, %v1792_v2  ;;  %v1823_v21 = vadd.f32 %v1814_v14, %v1791_v60 }
 0x483   :  { %2079 = vst.msk [vmem:[%s3352_s5 + $0x20] sm:$0xff] %vm2073_vm5, %v1825_v54 }
 0x484   :  { %v1828_v26 = vmax.f32 %v1824_v55, 0.0  ;;  %v1827_v53 = vmax.f32 %v1823_v21, 0.0 }
 0x485   :  { %v2056_v29 = vpop.permute.xlu1 %2055  ;;  %v2054_v63 = vpop.permute.xlu0 %2053 }
 0x486   :  { %2088 = vst.msk [vmem:[%s3352_s5 + $0x68] sm:$0xf] %vm2075_vm4, %v1828_v26  ;;  %v2066_v62 = vadd.f32 %v2056_v29, %v2034_v28  ;;  %v2065_v4 = vadd.f32 %v2054_v63, %v2033_v13 }
 0x487   :  { %2087 = vst.msk [vmem:[%s3352_s5 + $0x60] sm:$0xff] %vm2073_vm5, %v1827_v53 }
 0x488   :  { %v2070_v17 = vmax.f32 %v2066_v62, 0.0  ;;  %v2069_v16 = vmax.f32 %v2065_v4, 0.0 }
 0x489   :  { %v2060_v7 = vpop.permute.xlu1 %2059  ;;  %v2058_v30 = vpop.permute.xlu0 %2057 }
 0x48a   :  { %2082 = vst.msk [vmem:[%s3352_s5 + $0x38] sm:$0xf] %vm2075_vm4, %v2070_v17  ;;  %v2068_v32 = vadd.f32 %v2060_v7, %v2036_v27  ;;  %v2067_v50 = vadd.f32 %v2058_v30, %v2035_v58 }
 0x48b   :  { %2081 = vst.msk [vmem:[%s3352_s5 + $0x30] sm:$0xff] %vm2073_vm5, %v2069_v16 }
 0x48c   :  { %v2072_v49 = vmax.f32 %v2068_v32, 0.0  ;;  %v2071_v59 = vmax.f32 %v2067_v50, 0.0 }
 0x48e   :  { %2090 = vst.msk [vmem:[%s3352_s5 + $0x78] sm:$0xf] %vm2075_vm4, %v2072_v49 }
 0x48f   :  { %2089 = vst.msk [vmem:[%s3352_s5 + $0x70] sm:$0xff] %vm2073_vm5, %v2071_v59 }
 0x490   :  { %2095 = vsyncpa [#allocation4], 1 }
 0x491   :  { %2096 = vsyncpa [#allocation5], 1 }
 0x492   :  { %2097 = vsyncpa [#allocation8], 1 }

</bundles_post_ra>
